<compile_context>
chip_gen: v6e
topology: v6e:2x2x1
jax: 0.10.0
libtpu: 0.0.40
codegen_flags: <defaults>
</compile_context>

<pallas_src>
import jax
import jax.numpy as jnp
from jax.experimental import pallas as pl
from jax.experimental.pallas import tpu as pltpu

# ----------------------------- hyper-parameters ------------------------------
BATCH = 2
HISTORY = 8          # hparams.history_size
DOCVEC = 32          # docvec feature dim F
HEAD_NUM = 4         # hparams.head_num
HEAD_DIM = 16        # hparams.head_dim
EMBED = HEAD_NUM * HEAD_DIM          # D = 64
ATT_HIDDEN = 32      # hparams.attention_hidden_dim

# Column offsets inside the packed weight slab (64 rows, bf16):
#   [ Wq | Wk | Wv | Wo | Watt | Wne(rows 0:F valid, rest zero) ]
_OQ, _OK, _OV, _OO = 0, EMBED, 2 * EMBED, 3 * EMBED
_OATT = 4 * EMBED
_ONE = 4 * EMBED + ATT_HIDDEN
_W_COLS = 4 * EMBED + ATT_HIDDEN + EMBED            # 352

# Column offsets inside the packed bias/vector row (1, 384), f32:
#   [ bne | bq | bk | bv | bo | batt | qatt ]
_BNE, _BQ, _BK, _BV, _BO = 0, EMBED, 2 * EMBED, 3 * EMBED, 4 * EMBED
_BATT = 5 * EMBED
_BQATT = 5 * EMBED + ATT_HIDDEN
_B_COLS = 5 * EMBED + 2 * ATT_HIDDEN                # 384


# --------------------------------- kernel ------------------------------------
def user_encoder_kernel(x_ref, w_ref, b_ref, out_ref, qh_ref, kh_ref, vh_ref):
    f32 = jnp.float32
    M, F = x_ref.shape                       # M = B*H, pre-flattened in wrapper
    nh, dh, H, A = HEAD_NUM, HEAD_DIM, HISTORY, ATT_HIDDEN
    D = nh * dh
    B = M // H

    # ---- newsencoder: Linear(F -> D) + ReLU on all B*H rows at once --------
    wne = w_ref[0:F, _ONE:_ONE + D].astype(f32)                       # (F, D)
    h = jnp.dot(x_ref[...], wne, preferred_element_type=f32) + b_ref[0:1, _BNE:_BNE + D]
    h = jnp.maximum(h, 0.0)                                           # (M, D)

    # ---- Q/K/V projections, written head-major into VMEM scratch -----------
    # One small MXU dot per (projection, head); weight slices are static ref
    # loads, so no value-level lane extraction anywhere.
    for n in range(nh):
        c = n * dh
        qh_ref[n] = (jnp.dot(h, w_ref[:, _OQ + c:_OQ + c + dh].astype(f32),
                             preferred_element_type=f32)
                     + b_ref[0:1, _BQ + c:_BQ + c + dh])              # (M, dh)
        kh_ref[n] = (jnp.dot(h, w_ref[:, _OK + c:_OK + c + dh].astype(f32),
                             preferred_element_type=f32)
                     + b_ref[0:1, _BK + c:_BK + c + dh])
        vh_ref[n] = (jnp.dot(h, w_ref[:, _OV + c:_OV + c + dh].astype(f32),
                             preferred_element_type=f32)
                     + b_ref[0:1, _BV + c:_BV + c + dh])

    # ---- merged multi-head attention: ONE batched score/softmax/context ----
    # (nh, M, dh) -> (nh*B, H, dh): leading/sublane-split reshape only.
    qh = qh_ref[...].reshape(nh * B, H, dh)
    kh = kh_ref[...].reshape(nh * B, H, dh)
    vh = vh_ref[...].reshape(nh * B, H, dh)

    scale = 1.0 / (dh ** 0.5)
    s = jnp.einsum("bqd,bkd->bqk", qh, kh,
                   preferred_element_type=f32) * scale                # (nh*B, H, H)
    s = s - jnp.max(s, axis=-1, keepdims=True)
    p = jnp.exp(s)
    p = p * pl.reciprocal(jnp.sum(p, axis=-1, keepdims=True), approx=True)
    ctx = jnp.einsum("bqk,bkd->bqd", p, vh,
                     preferred_element_type=f32)                      # (nh*B, H, dh)
    ctx = ctx.reshape(nh, M, dh)

    # concat(heads) @ Wo  ==  sum_n head_n @ Wo[n*dh:(n+1)*dh, :]
    attn = jnp.zeros((M, D), dtype=f32)
    for n in range(nh):
        attn = attn + jnp.dot(ctx[n],
                              w_ref[n * dh:(n + 1) * dh, _OO:_OO + D].astype(f32),
                              preferred_element_type=f32)
    attn = attn + b_ref[0:1, _BO:_BO + D]                             # (M, D)

    # ---- AttLayer2: additive attention pooling over the history axis -------
    watt = w_ref[:, _OATT:_OATT + A].astype(f32)                      # (D, A)
    t = jnp.tanh(jnp.dot(attn, watt, preferred_element_type=f32)
                 + b_ref[0:1, _BATT:_BATT + A])                       # (M, A)
    qatt = b_ref[0:1, _BQATT:_BQATT + A]                              # (1, A)
    e = jnp.sum(t * qatt, axis=-1, keepdims=True)                     # (M, 1) XLU lane-reduce
    e = e.reshape(B, H, 1)
    e = e - jnp.max(e, axis=1, keepdims=True)
    a = jnp.exp(e)
    a = a / jnp.sum(a, axis=1, keepdims=True)                         # exact recip (final softmax)

    user = jnp.sum(attn.reshape(B, H, D) * a, axis=1)                 # (B, D)

    # ---- lane-dense output: single (1, B*D) = (1, 128) row ------------------
    out_ref[...] = jnp.concatenate([user[b:b + 1, :] for b in range(B)],
                                   axis=1).astype(out_ref.dtype)


# -------------------------------- wrapper -------------------------------------
def user_encoder(his, kp):
    """his: (B, H, F) float32; kp: packed kernel params (see pack_params)."""
    B, H, F = his.shape
    D = EMBED
    x = his.reshape(B * H, F)        # flatten outside the kernel (free XLA reshape)

    vmem_spec = lambda: pl.BlockSpec(memory_space=pltpu.MemorySpace.VMEM)

    out = pl.pallas_call(
        user_encoder_kernel,
        out_shape=jax.ShapeDtypeStruct((1, B * D), jnp.float32),
        in_specs=[vmem_spec(), vmem_spec(), vmem_spec()],
        out_specs=vmem_spec(),
        scratch_shapes=[
            pltpu.VMEM((HEAD_NUM, B * H, HEAD_DIM), jnp.float32),   # Q, head-major
            pltpu.VMEM((HEAD_NUM, B * H, HEAD_DIM), jnp.float32),   # K, head-major
            pltpu.VMEM((HEAD_NUM, B * H, HEAD_DIM), jnp.float32),   # V, head-major
        ],
    )(x, kp["w_all"], kp["bvec"])
    return out.reshape(B, D)         # lane-dense (1, B*D) back to (B, D) outside the kernel


# ----------------------- parameter init / packing ------------------------------
def init_params(key):
    ks = jax.random.split(key, 13)

    def w(k, shape, s=0.05):
        # Weight matrices are stored bf16 (halved DMA bytes); round-trip here so the
        # f32 reference and the bf16 kernel weights hold identical values.
        return (jax.random.normal(k, shape, jnp.float32) * s).astype(jnp.bfloat16).astype(jnp.float32)

    def b(k, shape, s=0.05):
        return jax.random.normal(k, shape, jnp.float32) * s

    return {
        # newsencoder: Linear(F -> D)  (pre-transposed: (in, out))
        "wne": w(ks[0], (DOCVEC, EMBED)), "bne": b(ks[1], (1, EMBED)),
        # MultiheadAttention in_proj (q/k/v, pre-transposed) + out_proj
        "wq": w(ks[2], (EMBED, EMBED)), "wk": w(ks[3], (EMBED, EMBED)), "wv": w(ks[4], (EMBED, EMBED)),
        "bq": b(ks[5], (1, EMBED)), "bk": b(ks[6], (1, EMBED)), "bv": b(ks[7], (1, EMBED)),
        "wo": w(ks[8], (EMBED, EMBED)), "bo": b(ks[9], (1, EMBED)),
        # AttLayer2
        "watt": w(ks[10], (EMBED, ATT_HIDDEN)), "batt": b(ks[11], (1, ATT_HIDDEN)),
        "qatt": b(ks[12], (1, ATT_HIDDEN)),
    }


def pack_params(p):
    """One-time host-side repack: 10 small params -> 1 bf16 weight slab + 1 f32 bias row."""
    D, A, F = EMBED, ATT_HIDDEN, DOCVEC
    wne_pad = jnp.zeros((D, D), jnp.float32).at[:F, :].set(p["wne"])   # rows F:D unused
    w_all = jnp.concatenate(
        [p["wq"], p["wk"], p["wv"], p["wo"], p["watt"], wne_pad], axis=1
    ).astype(jnp.bfloat16)                                             # (D, 352)
    assert w_all.shape == (D, _W_COLS)
    bvec = jnp.concatenate(
        [p["bne"], p["bq"], p["bk"], p["bv"], p["bo"], p["batt"], p["qatt"]], axis=1
    ).astype(jnp.float32)                                              # (1, 384)
    assert bvec.shape == (1, _B_COLS)
    return {"w_all": w_all, "bvec": bvec}


# ---------------------------- pure-JAX reference -------------------------------
def user_encoder_ref(his, p):
    B, H, F = his.shape
    h = jnp.maximum(his.reshape(B * H, F) @ p["wne"] + p["bne"], 0.0).reshape(B, H, -1)
    q = h @ p["wq"] + p["bq"]
    k = h @ p["wk"] + p["bk"]
    v = h @ p["wv"] + p["bv"]

    def split(z):  # (B, H, D) -> (B, nh, H, dh)
        return z.reshape(B, H, HEAD_NUM, HEAD_DIM).transpose(0, 2, 1, 3)

    qh, kh, vh = split(q), split(k), split(v)
    s = jnp.einsum("bnqd,bnkd->bnqk", qh, kh) / (HEAD_DIM ** 0.5)
    pattn = jax.nn.softmax(s, axis=-1)
    o = jnp.einsum("bnqk,bnkd->bnqd", pattn, vh)
    o = o.transpose(0, 2, 1, 3).reshape(B, H, -1)
    attn = o @ p["wo"] + p["bo"]

    t = jnp.tanh(attn @ p["watt"] + p["batt"])
    e = jnp.sum(t * p["qatt"], axis=-1, keepdims=True)
    a = jax.nn.softmax(e, axis=1)
    return jnp.sum(attn * a, axis=1)


# --------------------------------- main ----------------------------------------
if __name__ == "__main__":
    key = jax.random.PRNGKey(0)
    k_in, k_p = jax.random.split(key)

    his_input_title = jax.random.normal(k_in, (BATCH, HISTORY, DOCVEC), jnp.float32)
    params = init_params(k_p)
    packed = pack_params(params)

    out = user_encoder(his_input_title, packed)
    out = jax.block_until_ready(out)

    ref = user_encoder_ref(his_input_title, params)
    assert out.shape == (BATCH, EMBED)
    assert jnp.allclose(out, ref, atol=5e-4, rtol=5e-4), "mismatch vs JAX reference"

    print("KERNEL_OK")
</pallas_src>

<mosaic_0001>
module attributes {stable_mosaic.version = 11 : i64} {
  func.func @user_encoder_kernel(%arg0: memref<16x32xf32, #tpu.memory_space<vmem>>, %arg1: memref<64x352xbf16, #tpu.memory_space<vmem>>, %arg2: memref<1x384xf32, #tpu.memory_space<vmem>>, %arg3: memref<1x128xf32, #tpu.memory_space<vmem>>, %arg4: memref<4x16x16xf32, #tpu.memory_space<vmem>>, %arg5: memref<4x16x16xf32, #tpu.memory_space<vmem>>, %arg6: memref<4x16x16xf32, #tpu.memory_space<vmem>>) attributes {dimension_semantics = [], scalar_prefetch = 0 : i64, scratch_operands = 3 : i64, tpu.core_type = #tpu.core_type<tc>} {
    %c0 = arith.constant 0 : index
    %c288 = arith.constant 288 : index
    %0 = vector.load %arg1[%c0, %c288] : memref<64x352xbf16, #tpu.memory_space<vmem>>, vector<32x64xbf16>
    %1 = arith.extf %0 : vector<32x64xbf16> to vector<32x64xf32>
    %c0_0 = arith.constant 0 : index
    %c0_1 = arith.constant 0 : index
    %2 = vector.load %arg0[%c0_0, %c0_1] : memref<16x32xf32, #tpu.memory_space<vmem>>, vector<16x32xf32>
    %cst = arith.constant dense<0.000000e+00> : vector<16x64xf32>
    %3 = tpu.matmul %2, %1, %cst {dimension_numbers = #tpu.dot_dimension_numbers<[1], [0], [0], [1], [0, 0, 1, 1], [], []>} : vector<16x32xf32>, vector<32x64xf32>, vector<16x64xf32> -> vector<16x64xf32>
    %c0_2 = arith.constant 0 : index
    %c0_3 = arith.constant 0 : index
    %4 = vector.load %arg2[%c0_2, %c0_3] : memref<1x384xf32, #tpu.memory_space<vmem>>, vector<1x64xf32>
    %5 = vector.broadcast %4 : vector<1x64xf32> to vector<16x64xf32>
    %6 = arith.addf %3, %5 : vector<16x64xf32>
    %cst_4 = arith.constant 0.000000e+00 : f32
    %7 = vector.broadcast %cst_4 : f32 to vector<16x64xf32>
    %8 = arith.maximumf %6, %7 : vector<16x64xf32>
    %c0_5 = arith.constant 0 : index
    %c0_6 = arith.constant 0 : index
    %9 = vector.load %arg1[%c0_5, %c0_6] : memref<64x352xbf16, #tpu.memory_space<vmem>>, vector<64x16xbf16>
    %10 = arith.extf %9 : vector<64x16xbf16> to vector<64x16xf32>
    %cst_7 = arith.constant dense<0.000000e+00> : vector<16x16xf32>
    %11 = tpu.matmul %8, %10, %cst_7 {dimension_numbers = #tpu.dot_dimension_numbers<[1], [0], [0], [1], [0, 0, 1, 1], [], []>} : vector<16x64xf32>, vector<64x16xf32>, vector<16x16xf32> -> vector<16x16xf32>
    %c0_8 = arith.constant 0 : index
    %c64 = arith.constant 64 : index
    %12 = vector.load %arg2[%c0_8, %c64] : memref<1x384xf32, #tpu.memory_space<vmem>>, vector<1x16xf32>
    %13 = vector.broadcast %12 : vector<1x16xf32> to vector<16x16xf32>
    %14 = arith.addf %11, %13 : vector<16x16xf32>
    %c0_9 = arith.constant 0 : index
    %c0_10 = arith.constant 0 : index
    %c0_11 = arith.constant 0 : index
    %15 = vector.load %arg4[%c0_9, %c0_10, %c0_11] : memref<4x16x16xf32, #tpu.memory_space<vmem>>, vector<1x16x16xf32>
    %16 = vector.shape_cast %15 : vector<1x16x16xf32> to vector<16x16xf32>
    %17 = vector.shape_cast %14 : vector<16x16xf32> to vector<1x16x16xf32>
    tpu.vector_store %arg4[%c0_9, %c0_10, %c0_11], %17 {strides = array<i32>} : memref<4x16x16xf32, #tpu.memory_space<vmem>>, vector<1x16x16xf32>,
    %c0_12 = arith.constant 0 : index
    %c64_13 = arith.constant 64 : index
    %18 = vector.load %arg1[%c0_12, %c64_13] : memref<64x352xbf16, #tpu.memory_space<vmem>>, vector<64x16xbf16>
    %19 = arith.extf %18 : vector<64x16xbf16> to vector<64x16xf32>
    %cst_14 = arith.constant dense<0.000000e+00> : vector<16x16xf32>
    %20 = tpu.matmul %8, %19, %cst_14 {dimension_numbers = #tpu.dot_dimension_numbers<[1], [0], [0], [1], [0, 0, 1, 1], [], []>} : vector<16x64xf32>, vector<64x16xf32>, vector<16x16xf32> -> vector<16x16xf32>
    %c0_15 = arith.constant 0 : index
    %c128 = arith.constant 128 : index
    %21 = vector.load %arg2[%c0_15, %c128] : memref<1x384xf32, #tpu.memory_space<vmem>>, vector<1x16xf32>
    %22 = vector.broadcast %21 : vector<1x16xf32> to vector<16x16xf32>
    %23 = arith.addf %20, %22 : vector<16x16xf32>
    %c0_16 = arith.constant 0 : index
    %c0_17 = arith.constant 0 : index
    %c0_18 = arith.constant 0 : index
    %24 = vector.load %arg5[%c0_16, %c0_17, %c0_18] : memref<4x16x16xf32, #tpu.memory_space<vmem>>, vector<1x16x16xf32>
    %25 = vector.shape_cast %24 : vector<1x16x16xf32> to vector<16x16xf32>
    %26 = vector.shape_cast %23 : vector<16x16xf32> to vector<1x16x16xf32>
    tpu.vector_store %arg5[%c0_16, %c0_17, %c0_18], %26 {strides = array<i32>} : memref<4x16x16xf32, #tpu.memory_space<vmem>>, vector<1x16x16xf32>,
    %c0_19 = arith.constant 0 : index
    %c128_20 = arith.constant 128 : index
    %27 = vector.load %arg1[%c0_19, %c128_20] : memref<64x352xbf16, #tpu.memory_space<vmem>>, vector<64x16xbf16>
    %28 = arith.extf %27 : vector<64x16xbf16> to vector<64x16xf32>
    %cst_21 = arith.constant dense<0.000000e+00> : vector<16x16xf32>
    %29 = tpu.matmul %8, %28, %cst_21 {dimension_numbers = #tpu.dot_dimension_numbers<[1], [0], [0], [1], [0, 0, 1, 1], [], []>} : vector<16x64xf32>, vector<64x16xf32>, vector<16x16xf32> -> vector<16x16xf32>
    %c0_22 = arith.constant 0 : index
    %c192 = arith.constant 192 : index
    %30 = vector.load %arg2[%c0_22, %c192] : memref<1x384xf32, #tpu.memory_space<vmem>>, vector<1x16xf32>
    %31 = vector.broadcast %30 : vector<1x16xf32> to vector<16x16xf32>
    %32 = arith.addf %29, %31 : vector<16x16xf32>
    %c0_23 = arith.constant 0 : index
    %c0_24 = arith.constant 0 : index
    %c0_25 = arith.constant 0 : index
    %33 = vector.load %arg6[%c0_23, %c0_24, %c0_25] : memref<4x16x16xf32, #tpu.memory_space<vmem>>, vector<1x16x16xf32>
    %34 = vector.shape_cast %33 : vector<1x16x16xf32> to vector<16x16xf32>
    %35 = vector.shape_cast %32 : vector<16x16xf32> to vector<1x16x16xf32>
    tpu.vector_store %arg6[%c0_23, %c0_24, %c0_25], %35 {strides = array<i32>} : memref<4x16x16xf32, #tpu.memory_space<vmem>>, vector<1x16x16xf32>,
    %c0_26 = arith.constant 0 : index
    %c16 = arith.constant 16 : index
    %36 = vector.load %arg1[%c0_26, %c16] : memref<64x352xbf16, #tpu.memory_space<vmem>>, vector<64x16xbf16>
    %37 = arith.extf %36 : vector<64x16xbf16> to vector<64x16xf32>
    %cst_27 = arith.constant dense<0.000000e+00> : vector<16x16xf32>
    %38 = tpu.matmul %8, %37, %cst_27 {dimension_numbers = #tpu.dot_dimension_numbers<[1], [0], [0], [1], [0, 0, 1, 1], [], []>} : vector<16x64xf32>, vector<64x16xf32>, vector<16x16xf32> -> vector<16x16xf32>
    %c0_28 = arith.constant 0 : index
    %c80 = arith.constant 80 : index
    %39 = vector.load %arg2[%c0_28, %c80] : memref<1x384xf32, #tpu.memory_space<vmem>>, vector<1x16xf32>
    %40 = vector.broadcast %39 : vector<1x16xf32> to vector<16x16xf32>
    %41 = arith.addf %38, %40 : vector<16x16xf32>
    %c1 = arith.constant 1 : index
    %c0_29 = arith.constant 0 : index
    %c0_30 = arith.constant 0 : index
    %42 = vector.load %arg4[%c1, %c0_29, %c0_30] : memref<4x16x16xf32, #tpu.memory_space<vmem>>, vector<1x16x16xf32>
    %43 = vector.shape_cast %42 : vector<1x16x16xf32> to vector<16x16xf32>
    %44 = vector.shape_cast %41 : vector<16x16xf32> to vector<1x16x16xf32>
    tpu.vector_store %arg4[%c1, %c0_29, %c0_30], %44 {strides = array<i32>} : memref<4x16x16xf32, #tpu.memory_space<vmem>>, vector<1x16x16xf32>,
    %c0_31 = arith.constant 0 : index
    %c80_32 = arith.constant 80 : index
    %45 = vector.load %arg1[%c0_31, %c80_32] : memref<64x352xbf16, #tpu.memory_space<vmem>>, vector<64x16xbf16>
    %46 = arith.extf %45 : vector<64x16xbf16> to vector<64x16xf32>
    %cst_33 = arith.constant dense<0.000000e+00> : vector<16x16xf32>
    %47 = tpu.matmul %8, %46, %cst_33 {dimension_numbers = #tpu.dot_dimension_numbers<[1], [0], [0], [1], [0, 0, 1, 1], [], []>} : vector<16x64xf32>, vector<64x16xf32>, vector<16x16xf32> -> vector<16x16xf32>
    %c0_34 = arith.constant 0 : index
    %c144 = arith.constant 144 : index
    %48 = vector.load %arg2[%c0_34, %c144] : memref<1x384xf32, #tpu.memory_space<vmem>>, vector<1x16xf32>
    %49 = vector.broadcast %48 : vector<1x16xf32> to vector<16x16xf32>
    %50 = arith.addf %47, %49 : vector<16x16xf32>
    %c1_35 = arith.constant 1 : index
    %c0_36 = arith.constant 0 : index
    %c0_37 = arith.constant 0 : index
    %51 = vector.load %arg5[%c1_35, %c0_36, %c0_37] : memref<4x16x16xf32, #tpu.memory_space<vmem>>, vector<1x16x16xf32>
    %52 = vector.shape_cast %51 : vector<1x16x16xf32> to vector<16x16xf32>
    %53 = vector.shape_cast %50 : vector<16x16xf32> to vector<1x16x16xf32>
    tpu.vector_store %arg5[%c1_35, %c0_36, %c0_37], %53 {strides = array<i32>} : memref<4x16x16xf32, #tpu.memory_space<vmem>>, vector<1x16x16xf32>,
    %c0_38 = arith.constant 0 : index
    %c144_39 = arith.constant 144 : index
    %54 = vector.load %arg1[%c0_38, %c144_39] : memref<64x352xbf16, #tpu.memory_space<vmem>>, vector<64x16xbf16>
    %55 = arith.extf %54 : vector<64x16xbf16> to vector<64x16xf32>
    %cst_40 = arith.constant dense<0.000000e+00> : vector<16x16xf32>
    %56 = tpu.matmul %8, %55, %cst_40 {dimension_numbers = #tpu.dot_dimension_numbers<[1], [0], [0], [1], [0, 0, 1, 1], [], []>} : vector<16x64xf32>, vector<64x16xf32>, vector<16x16xf32> -> vector<16x16xf32>
    %c0_41 = arith.constant 0 : index
    %c208 = arith.constant 208 : index
    %57 = vector.load %arg2[%c0_41, %c208] : memref<1x384xf32, #tpu.memory_space<vmem>>, vector<1x16xf32>
    %58 = vector.broadcast %57 : vector<1x16xf32> to vector<16x16xf32>
    %59 = arith.addf %56, %58 : vector<16x16xf32>
    %c1_42 = arith.constant 1 : index
    %c0_43 = arith.constant 0 : index
    %c0_44 = arith.constant 0 : index
    %60 = vector.load %arg6[%c1_42, %c0_43, %c0_44] : memref<4x16x16xf32, #tpu.memory_space<vmem>>, vector<1x16x16xf32>
    %61 = vector.shape_cast %60 : vector<1x16x16xf32> to vector<16x16xf32>
    %62 = vector.shape_cast %59 : vector<16x16xf32> to vector<1x16x16xf32>
    tpu.vector_store %arg6[%c1_42, %c0_43, %c0_44], %62 {strides = array<i32>} : memref<4x16x16xf32, #tpu.memory_space<vmem>>, vector<1x16x16xf32>,
    %c0_45 = arith.constant 0 : index
    %c32 = arith.constant 32 : index
    %63 = vector.load %arg1[%c0_45, %c32] : memref<64x352xbf16, #tpu.memory_space<vmem>>, vector<64x16xbf16>
    %64 = arith.extf %63 : vector<64x16xbf16> to vector<64x16xf32>
    %cst_46 = arith.constant dense<0.000000e+00> : vector<16x16xf32>
    %65 = tpu.matmul %8, %64, %cst_46 {dimension_numbers = #tpu.dot_dimension_numbers<[1], [0], [0], [1], [0, 0, 1, 1], [], []>} : vector<16x64xf32>, vector<64x16xf32>, vector<16x16xf32> -> vector<16x16xf32>
    %c0_47 = arith.constant 0 : index
    %c96 = arith.constant 96 : index
    %66 = vector.load %arg2[%c0_47, %c96] : memref<1x384xf32, #tpu.memory_space<vmem>>, vector<1x16xf32>
    %67 = vector.broadcast %66 : vector<1x16xf32> to vector<16x16xf32>
    %68 = arith.addf %65, %67 : vector<16x16xf32>
    %c2 = arith.constant 2 : index
    %c0_48 = arith.constant 0 : index
    %c0_49 = arith.constant 0 : index
    %69 = vector.load %arg4[%c2, %c0_48, %c0_49] : memref<4x16x16xf32, #tpu.memory_space<vmem>>, vector<1x16x16xf32>
    %70 = vector.shape_cast %69 : vector<1x16x16xf32> to vector<16x16xf32>
    %71 = vector.shape_cast %68 : vector<16x16xf32> to vector<1x16x16xf32>
    tpu.vector_store %arg4[%c2, %c0_48, %c0_49], %71 {strides = array<i32>} : memref<4x16x16xf32, #tpu.memory_space<vmem>>, vector<1x16x16xf32>,
    %c0_50 = arith.constant 0 : index
    %c96_51 = arith.constant 96 : index
    %72 = vector.load %arg1[%c0_50, %c96_51] : memref<64x352xbf16, #tpu.memory_space<vmem>>, vector<64x16xbf16>
    %73 = arith.extf %72 : vector<64x16xbf16> to vector<64x16xf32>
    %cst_52 = arith.constant dense<0.000000e+00> : vector<16x16xf32>
    %74 = tpu.matmul %8, %73, %cst_52 {dimension_numbers = #tpu.dot_dimension_numbers<[1], [0], [0], [1], [0, 0, 1, 1], [], []>} : vector<16x64xf32>, vector<64x16xf32>, vector<16x16xf32> -> vector<16x16xf32>
    %c0_53 = arith.constant 0 : index
    %c160 = arith.constant 160 : index
    %75 = vector.load %arg2[%c0_53, %c160] : memref<1x384xf32, #tpu.memory_space<vmem>>, vector<1x16xf32>
    %76 = vector.broadcast %75 : vector<1x16xf32> to vector<16x16xf32>
    %77 = arith.addf %74, %76 : vector<16x16xf32>
    %c2_54 = arith.constant 2 : index
    %c0_55 = arith.constant 0 : index
    %c0_56 = arith.constant 0 : index
    %78 = vector.load %arg5[%c2_54, %c0_55, %c0_56] : memref<4x16x16xf32, #tpu.memory_space<vmem>>, vector<1x16x16xf32>
    %79 = vector.shape_cast %78 : vector<1x16x16xf32> to vector<16x16xf32>
    %80 = vector.shape_cast %77 : vector<16x16xf32> to vector<1x16x16xf32>
    tpu.vector_store %arg5[%c2_54, %c0_55, %c0_56], %80 {strides = array<i32>} : memref<4x16x16xf32, #tpu.memory_space<vmem>>, vector<1x16x16xf32>,
    %c0_57 = arith.constant 0 : index
    %c160_58 = arith.constant 160 : index
    %81 = vector.load %arg1[%c0_57, %c160_58] : memref<64x352xbf16, #tpu.memory_space<vmem>>, vector<64x16xbf16>
    %82 = arith.extf %81 : vector<64x16xbf16> to vector<64x16xf32>
    %cst_59 = arith.constant dense<0.000000e+00> : vector<16x16xf32>
    %83 = tpu.matmul %8, %82, %cst_59 {dimension_numbers = #tpu.dot_dimension_numbers<[1], [0], [0], [1], [0, 0, 1, 1], [], []>} : vector<16x64xf32>, vector<64x16xf32>, vector<16x16xf32> -> vector<16x16xf32>
    %c0_60 = arith.constant 0 : index
    %c224 = arith.constant 224 : index
    %84 = vector.load %arg2[%c0_60, %c224] : memref<1x384xf32, #tpu.memory_space<vmem>>, vector<1x16xf32>
    %85 = vector.broadcast %84 : vector<1x16xf32> to vector<16x16xf32>
    %86 = arith.addf %83, %85 : vector<16x16xf32>
    %c2_61 = arith.constant 2 : index
    %c0_62 = arith.constant 0 : index
    %c0_63 = arith.constant 0 : index
    %87 = vector.load %arg6[%c2_61, %c0_62, %c0_63] : memref<4x16x16xf32, #tpu.memory_space<vmem>>, vector<1x16x16xf32>
    %88 = vector.shape_cast %87 : vector<1x16x16xf32> to vector<16x16xf32>
    %89 = vector.shape_cast %86 : vector<16x16xf32> to vector<1x16x16xf32>
    tpu.vector_store %arg6[%c2_61, %c0_62, %c0_63], %89 {strides = array<i32>} : memref<4x16x16xf32, #tpu.memory_space<vmem>>, vector<1x16x16xf32>,
    %c0_64 = arith.constant 0 : index
    %c48 = arith.constant 48 : index
    %90 = vector.load %arg1[%c0_64, %c48] : memref<64x352xbf16, #tpu.memory_space<vmem>>, vector<64x16xbf16>
    %91 = arith.extf %90 : vector<64x16xbf16> to vector<64x16xf32>
    %cst_65 = arith.constant dense<0.000000e+00> : vector<16x16xf32>
    %92 = tpu.matmul %8, %91, %cst_65 {dimension_numbers = #tpu.dot_dimension_numbers<[1], [0], [0], [1], [0, 0, 1, 1], [], []>} : vector<16x64xf32>, vector<64x16xf32>, vector<16x16xf32> -> vector<16x16xf32>
    %c0_66 = arith.constant 0 : index
    %c112 = arith.constant 112 : index
    %93 = vector.load %arg2[%c0_66, %c112] : memref<1x384xf32, #tpu.memory_space<vmem>>, vector<1x16xf32>
    %94 = vector.broadcast %93 : vector<1x16xf32> to vector<16x16xf32>
    %95 = arith.addf %92, %94 : vector<16x16xf32>
    %c3 = arith.constant 3 : index
    %c0_67 = arith.constant 0 : index
    %c0_68 = arith.constant 0 : index
    %96 = vector.load %arg4[%c3, %c0_67, %c0_68] : memref<4x16x16xf32, #tpu.memory_space<vmem>>, vector<1x16x16xf32>
    %97 = vector.shape_cast %96 : vector<1x16x16xf32> to vector<16x16xf32>
    %98 = vector.shape_cast %95 : vector<16x16xf32> to vector<1x16x16xf32>
    tpu.vector_store %arg4[%c3, %c0_67, %c0_68], %98 {strides = array<i32>} : memref<4x16x16xf32, #tpu.memory_space<vmem>>, vector<1x16x16xf32>,
    %c0_69 = arith.constant 0 : index
    %c112_70 = arith.constant 112 : index
    %99 = vector.load %arg1[%c0_69, %c112_70] : memref<64x352xbf16, #tpu.memory_space<vmem>>, vector<64x16xbf16>
    %100 = arith.extf %99 : vector<64x16xbf16> to vector<64x16xf32>
    %cst_71 = arith.constant dense<0.000000e+00> : vector<16x16xf32>
    %101 = tpu.matmul %8, %100, %cst_71 {dimension_numbers = #tpu.dot_dimension_numbers<[1], [0], [0], [1], [0, 0, 1, 1], [], []>} : vector<16x64xf32>, vector<64x16xf32>, vector<16x16xf32> -> vector<16x16xf32>
    %c0_72 = arith.constant 0 : index
    %c176 = arith.constant 176 : index
    %102 = vector.load %arg2[%c0_72, %c176] : memref<1x384xf32, #tpu.memory_space<vmem>>, vector<1x16xf32>
    %103 = vector.broadcast %102 : vector<1x16xf32> to vector<16x16xf32>
    %104 = arith.addf %101, %103 : vector<16x16xf32>
    %c3_73 = arith.constant 3 : index
    %c0_74 = arith.constant 0 : index
    %c0_75 = arith.constant 0 : index
    %105 = vector.load %arg5[%c3_73, %c0_74, %c0_75] : memref<4x16x16xf32, #tpu.memory_space<vmem>>, vector<1x16x16xf32>
    %106 = vector.shape_cast %105 : vector<1x16x16xf32> to vector<16x16xf32>
    %107 = vector.shape_cast %104 : vector<16x16xf32> to vector<1x16x16xf32>
    tpu.vector_store %arg5[%c3_73, %c0_74, %c0_75], %107 {strides = array<i32>} : memref<4x16x16xf32, #tpu.memory_space<vmem>>, vector<1x16x16xf32>,
    %c0_76 = arith.constant 0 : index
    %c176_77 = arith.constant 176 : index
    %108 = vector.load %arg1[%c0_76, %c176_77] : memref<64x352xbf16, #tpu.memory_space<vmem>>, vector<64x16xbf16>
    %109 = arith.extf %108 : vector<64x16xbf16> to vector<64x16xf32>
    %cst_78 = arith.constant dense<0.000000e+00> : vector<16x16xf32>
    %110 = tpu.matmul %8, %109, %cst_78 {dimension_numbers = #tpu.dot_dimension_numbers<[1], [0], [0], [1], [0, 0, 1, 1], [], []>} : vector<16x64xf32>, vector<64x16xf32>, vector<16x16xf32> -> vector<16x16xf32>
    %c0_79 = arith.constant 0 : index
    %c240 = arith.constant 240 : index
    %111 = vector.load %arg2[%c0_79, %c240] : memref<1x384xf32, #tpu.memory_space<vmem>>, vector<1x16xf32>
    %112 = vector.broadcast %111 : vector<1x16xf32> to vector<16x16xf32>
    %113 = arith.addf %110, %112 : vector<16x16xf32>
    %c3_80 = arith.constant 3 : index
    %c0_81 = arith.constant 0 : index
    %c0_82 = arith.constant 0 : index
    %114 = vector.load %arg6[%c3_80, %c0_81, %c0_82] : memref<4x16x16xf32, #tpu.memory_space<vmem>>, vector<1x16x16xf32>
    %115 = vector.shape_cast %114 : vector<1x16x16xf32> to vector<16x16xf32>
    %116 = vector.shape_cast %113 : vector<16x16xf32> to vector<1x16x16xf32>
    tpu.vector_store %arg6[%c3_80, %c0_81, %c0_82], %116 {strides = array<i32>} : memref<4x16x16xf32, #tpu.memory_space<vmem>>, vector<1x16x16xf32>,
    %c0_83 = arith.constant 0 : index
    %c0_84 = arith.constant 0 : index
    %c0_85 = arith.constant 0 : index
    %117 = vector.load %arg4[%c0_83, %c0_84, %c0_85] : memref<4x16x16xf32, #tpu.memory_space<vmem>>, vector<4x16x16xf32>
    %118 = vector.shape_cast %117 : vector<4x16x16xf32> to vector<8x8x16xf32>
    %c0_86 = arith.constant 0 : index
    %c0_87 = arith.constant 0 : index
    %c0_88 = arith.constant 0 : index
    %119 = vector.load %arg5[%c0_86, %c0_87, %c0_88] : memref<4x16x16xf32, #tpu.memory_space<vmem>>, vector<4x16x16xf32>
    %120 = vector.shape_cast %119 : vector<4x16x16xf32> to vector<8x8x16xf32>
    %c0_89 = arith.constant 0 : index
    %c0_90 = arith.constant 0 : index
    %c0_91 = arith.constant 0 : index
    %121 = vector.load %arg6[%c0_89, %c0_90, %c0_91] : memref<4x16x16xf32, #tpu.memory_space<vmem>>, vector<4x16x16xf32>
    %122 = vector.shape_cast %121 : vector<4x16x16xf32> to vector<8x8x16xf32>
    "tpu.trace_start"() <{level = 10 : i32, message = "bqd,bkd->bqk"}> : () -> ()
    %cst_92 = arith.constant dense<0.000000e+00> : vector<8x8x8xf32>
    %123 = tpu.matmul %118, %120, %cst_92 {dimension_numbers = #tpu.dot_dimension_numbers<[2], [2], [1], [1], [0, 0, 0, 1, 1, 1], [0], [0]>} : vector<8x8x16xf32>, vector<8x8x16xf32>, vector<8x8x8xf32> -> vector<8x8x8xf32>
    "tpu.trace_stop"() : () -> ()
    %cst_93 = arith.constant 2.500000e-01 : f32
    %124 = vector.broadcast %cst_93 : f32 to vector<8x8x8xf32>
    %125 = arith.mulf %123, %124 : vector<8x8x8xf32>
    %cst_94 = arith.constant dense<0xFF800000> : vector<8x8xf32>
    %126 = vector.multi_reduction <maximumf>, %125, %cst_94 [2] : vector<8x8x8xf32> to vector<8x8xf32>
    %127 = vector.shape_cast %126 : vector<8x8xf32> to vector<8x8x1xf32>
    %128 = vector.broadcast %127 : vector<8x8x1xf32> to vector<8x8x8xf32>
    %129 = arith.subf %125, %128 : vector<8x8x8xf32>
    %130 = math.exp %129 : vector<8x8x8xf32>
    %cst_95 = arith.constant dense<0.000000e+00> : vector<8x8xf32>
    %131 = vector.multi_reduction <add>, %130, %cst_95 [2] : vector<8x8x8xf32> to vector<8x8xf32>
    %132 = vector.shape_cast %131 : vector<8x8xf32> to vector<8x8x1xf32>
    %133 = tpu.reciprocal %132 {approx = true} : vector<8x8x1xf32> -> vector<8x8x1xf32>
    %134 = vector.broadcast %133 : vector<8x8x1xf32> to vector<8x8x8xf32>
    %135 = arith.mulf %130, %134 : vector<8x8x8xf32>
    "tpu.trace_start"() <{level = 10 : i32, message = "bqk,bkd->bqd"}> : () -> ()
    %cst_96 = arith.constant dense<0.000000e+00> : vector<8x8x16xf32>
    %136 = tpu.matmul %135, %122, %cst_96 {dimension_numbers = #tpu.dot_dimension_numbers<[2], [1], [1], [2], [0, 0, 0, 1, 1, 2], [0], [0]>} : vector<8x8x8xf32>, vector<8x8x16xf32>, vector<8x8x16xf32> -> vector<8x8x16xf32>
    "tpu.trace_stop"() : () -> ()
    %137 = vector.shape_cast %136 : vector<8x8x16xf32> to vector<4x16x16xf32>
    %cst_97 = arith.constant 0.000000e+00 : f32
    %138 = vector.broadcast %cst_97 : f32 to vector<16x64xf32>
    %139 = vector.extract_strided_slice %137 {offsets = [0, 0, 0], sizes = [1, 16, 16], strides = [1, 1, 1]} : vector<4x16x16xf32> to vector<1x16x16xf32>
    %140 = vector.shape_cast %139 : vector<1x16x16xf32> to vector<16x16xf32>
    %c0_98 = arith.constant 0 : index
    %c192_99 = arith.constant 192 : index
    %141 = vector.load %arg1[%c0_98, %c192_99] : memref<64x352xbf16, #tpu.memory_space<vmem>>, vector<16x64xbf16>
    %142 = arith.extf %141 : vector<16x64xbf16> to vector<16x64xf32>
    %cst_100 = arith.constant dense<0.000000e+00> : vector<16x64xf32>
    %143 = tpu.matmul %140, %142, %cst_100 {dimension_numbers = #tpu.dot_dimension_numbers<[1], [0], [0], [1], [0, 0, 1, 1], [], []>} : vector<16x16xf32>, vector<16x64xf32>, vector<16x64xf32> -> vector<16x64xf32>
    %144 = arith.addf %138, %143 : vector<16x64xf32>
    %145 = vector.extract_strided_slice %137 {offsets = [1, 0, 0], sizes = [1, 16, 16], strides = [1, 1, 1]} : vector<4x16x16xf32> to vector<1x16x16xf32>
    %146 = vector.shape_cast %145 : vector<1x16x16xf32> to vector<16x16xf32>
    %c16_101 = arith.constant 16 : index
    %c192_102 = arith.constant 192 : index
    %147 = vector.load %arg1[%c16_101, %c192_102] : memref<64x352xbf16, #tpu.memory_space<vmem>>, vector<16x64xbf16>
    %148 = arith.extf %147 : vector<16x64xbf16> to vector<16x64xf32>
    %cst_103 = arith.constant dense<0.000000e+00> : vector<16x64xf32>
    %149 = tpu.matmul %146, %148, %cst_103 {dimension_numbers = #tpu.dot_dimension_numbers<[1], [0], [0], [1], [0, 0, 1, 1], [], []>} : vector<16x16xf32>, vector<16x64xf32>, vector<16x64xf32> -> vector<16x64xf32>
    %150 = arith.addf %144, %149 : vector<16x64xf32>
    %151 = vector.extract_strided_slice %137 {offsets = [2, 0, 0], sizes = [1, 16, 16], strides = [1, 1, 1]} : vector<4x16x16xf32> to vector<1x16x16xf32>
    %152 = vector.shape_cast %151 : vector<1x16x16xf32> to vector<16x16xf32>
    %c32_104 = arith.constant 32 : index
    %c192_105 = arith.constant 192 : index
    %153 = vector.load %arg1[%c32_104, %c192_105] : memref<64x352xbf16, #tpu.memory_space<vmem>>, vector<16x64xbf16>
    %154 = arith.extf %153 : vector<16x64xbf16> to vector<16x64xf32>
    %cst_106 = arith.constant dense<0.000000e+00> : vector<16x64xf32>
    %155 = tpu.matmul %152, %154, %cst_106 {dimension_numbers = #tpu.dot_dimension_numbers<[1], [0], [0], [1], [0, 0, 1, 1], [], []>} : vector<16x16xf32>, vector<16x64xf32>, vector<16x64xf32> -> vector<16x64xf32>
    %156 = arith.addf %150, %155 : vector<16x64xf32>
    %157 = vector.extract_strided_slice %137 {offsets = [3, 0, 0], sizes = [1, 16, 16], strides = [1, 1, 1]} : vector<4x16x16xf32> to vector<1x16x16xf32>
    %158 = vector.shape_cast %157 : vector<1x16x16xf32> to vector<16x16xf32>
    %c48_107 = arith.constant 48 : index
    %c192_108 = arith.constant 192 : index
    %159 = vector.load %arg1[%c48_107, %c192_108] : memref<64x352xbf16, #tpu.memory_space<vmem>>, vector<16x64xbf16>
    %160 = arith.extf %159 : vector<16x64xbf16> to vector<16x64xf32>
    %cst_109 = arith.constant dense<0.000000e+00> : vector<16x64xf32>
    %161 = tpu.matmul %158, %160, %cst_109 {dimension_numbers = #tpu.dot_dimension_numbers<[1], [0], [0], [1], [0, 0, 1, 1], [], []>} : vector<16x16xf32>, vector<16x64xf32>, vector<16x64xf32> -> vector<16x64xf32>
    %162 = arith.addf %156, %161 : vector<16x64xf32>
    %c0_110 = arith.constant 0 : index
    %c256 = arith.constant 256 : index
    %163 = vector.load %arg2[%c0_110, %c256] : memref<1x384xf32, #tpu.memory_space<vmem>>, vector<1x64xf32>
    %164 = vector.broadcast %163 : vector<1x64xf32> to vector<16x64xf32>
    %165 = arith.addf %162, %164 : vector<16x64xf32>
    %c0_111 = arith.constant 0 : index
    %c256_112 = arith.constant 256 : index
    %166 = vector.load %arg1[%c0_111, %c256_112] : memref<64x352xbf16, #tpu.memory_space<vmem>>, vector<64x32xbf16>
    %167 = arith.extf %166 : vector<64x32xbf16> to vector<64x32xf32>
    %cst_113 = arith.constant dense<0.000000e+00> : vector<16x32xf32>
    %168 = tpu.matmul %165, %167, %cst_113 {dimension_numbers = #tpu.dot_dimension_numbers<[1], [0], [0], [1], [0, 0, 1, 1], [], []>} : vector<16x64xf32>, vector<64x32xf32>, vector<16x32xf32> -> vector<16x32xf32>
    %c0_114 = arith.constant 0 : index
    %c320 = arith.constant 320 : index
    %169 = vector.load %arg2[%c0_114, %c320] : memref<1x384xf32, #tpu.memory_space<vmem>>, vector<1x32xf32>
    %170 = vector.broadcast %169 : vector<1x32xf32> to vector<16x32xf32>
    %171 = arith.addf %168, %170 : vector<16x32xf32>
    %172 = math.tanh %171 : vector<16x32xf32>
    %c0_115 = arith.constant 0 : index
    %c352 = arith.constant 352 : index
    %173 = vector.load %arg2[%c0_115, %c352] : memref<1x384xf32, #tpu.memory_space<vmem>>, vector<1x32xf32>
    %174 = vector.broadcast %173 : vector<1x32xf32> to vector<16x32xf32>
    %175 = arith.mulf %172, %174 : vector<16x32xf32>
    %cst_116 = arith.constant dense<0.000000e+00> : vector<16xf32>
    %176 = vector.multi_reduction <add>, %175, %cst_116 [1] : vector<16x32xf32> to vector<16xf32>
    %177 = vector.shape_cast %176 : vector<16xf32> to vector<16x1xf32>
    %178 = vector.shape_cast %177 : vector<16x1xf32> to vector<2x8x1xf32>
    %cst_117 = arith.constant dense<0xFF800000> : vector<2x1xf32>
    %179 = vector.multi_reduction <maximumf>, %178, %cst_117 [1] : vector<2x8x1xf32> to vector<2x1xf32>
    %180 = vector.shape_cast %179 : vector<2x1xf32> to vector<2x1x1xf32>
    %181 = vector.broadcast %180 : vector<2x1x1xf32> to vector<2x8x1xf32>
    %182 = arith.subf %178, %181 : vector<2x8x1xf32>
    %183 = math.exp %182 : vector<2x8x1xf32>
    %cst_118 = arith.constant dense<0.000000e+00> : vector<2x1xf32>
    %184 = vector.multi_reduction <add>, %183, %cst_118 [1] : vector<2x8x1xf32> to vector<2x1xf32>
    %185 = vector.shape_cast %184 : vector<2x1xf32> to vector<2x1x1xf32>
    %186 = vector.broadcast %185 : vector<2x1x1xf32> to vector<2x8x1xf32>
    %187 = arith.divf %183, %186 : vector<2x8x1xf32>
    %188 = vector.shape_cast %165 : vector<16x64xf32> to vector<2x8x64xf32>
    %189 = vector.broadcast %187 : vector<2x8x1xf32> to vector<2x8x64xf32>
    %190 = arith.mulf %188, %189 : vector<2x8x64xf32>
    %cst_119 = arith.constant dense<0.000000e+00> : vector<2x64xf32>
    %191 = vector.multi_reduction <add>, %190, %cst_119 [1] : vector<2x8x64xf32> to vector<2x64xf32>
    %192 = vector.extract_strided_slice %191 {offsets = [0, 0], sizes = [1, 64], strides = [1, 1]} : vector<2x64xf32> to vector<1x64xf32>
    %193 = vector.extract_strided_slice %191 {offsets = [1, 0], sizes = [1, 64], strides = [1, 1]} : vector<2x64xf32> to vector<1x64xf32>
    %194 = tpu.concatenate %192, %193 in 1 : vector<1x64xf32>, vector<1x64xf32> -> vector<1x128xf32>
    %c0_120 = arith.constant 0 : index
    %c0_121 = arith.constant 0 : index
    %195 = vector.load %arg3[%c0_120, %c0_121] : memref<1x128xf32, #tpu.memory_space<vmem>>, vector<1x128xf32>
    tpu.vector_store %arg3[%c0_120, %c0_121], %194 {strides = array<i32>} : memref<1x128xf32, #tpu.memory_space<vmem>>, vector<1x128xf32>,
    return
  }
}

</mosaic_0001>

<bundles_post_ra>
// kernel: tpu_custom_call.1
= control target key start
LH: loop header
LB: loop body
LE: loop exit
PB: predicated region body
PF: predicated region fallthrough
CT: control target
= control target key end

     0   :  { %8 = vsyncpa [#allocation6], 0  ;;  %s5213_s0 = inlined_call_operand.hbm [shape: f32[16,32], index: 0, kind: input, shape index: {}]   ;;  %s5214_s1 = inlined_call_operand.hbm [shape: bf16[64,352], index: 1, kind: input, shape index: {}]   ;;  %s5215_s2 = inlined_call_operand.vmem [shape: f32[1,384], index: 2, kind: input, shape index: {}]   ;;  %s5216_s3 = inlined_call_operand.hbm [shape: f32[1,128], index: 3, kind: output, shape index: {}]  }
   0x1   :  { %9 = vsyncpa [#allocation9], 0 }
   0x2   :  { %10 = vsyncpa [#allocation7], 0  ;;  %s4555_s12 = smov [#allocation5]  }
   0x3   :  { %s16_s13 = sshll.u32 %s4555_s12, 4  ;;  %s17_s13 = int_to_ptr.vmem [resolvable:$true] %s16_s13 }
   0x4   :  { %s4497_s14 = scalar_lea.vmem %s17_s13, 256  ;;  %p4502_p1 = scmp.lt.s32.totalorder %s17_s13, %s17_s13 }
   0x5   :  { %p4498_p0 = scmp.ne.s32.totalorder %s17_s13, %s4497_s14  ;;  %p4503_p2 = scmp.lt.s32.totalorder %s4497_s14, %s4497_s14 }
   0x7   :  { %p4504_p3 = por %p4503_p2, %p4502_p1 }
   0x9   :  { %p4505_p4 = pnand %p4504_p3, %p4498_p0 }
   0xb   :  { %4508 = shalt.err (!%p4505_p4)
}
   0xc   :  { %s4556_s15 = smov 128   ;;  %s4557_s16 = smov 8  }
   0xd   :  { %22 = dma.hbm_to_vmem [thread:$0]  %s5213_s0, 256, %s17_s13, [#allocation6], %s4556_s15, %s4556_s15, %s4557_s16  }
   0xe   :  { %s4558_s19 = smov [#allocation8]  }
   0xf   :  { %s28_s20 = sshll.u32 %s4558_s19, 4  ;;  %s29_s20 = int_to_ptr.vmem [resolvable:$true] %s28_s20 }
  0x10   :  { %s4517_s21 = scalar_lea.vmem %s29_s20, 1536  ;;  %p4522_p6 = scmp.lt.s32.totalorder %s29_s20, %s29_s20 }
  0x11   :  { %p4518_p5 = scmp.ne.s32.totalorder %s29_s20, %s4517_s21  ;;  %p4523_p7 = scmp.lt.s32.totalorder %s4517_s21, %s4517_s21 }
  0x13   :  { %p4524_p8 = por %p4523_p7, %p4522_p6 }
  0x15   :  { %p4525_p9 = pnand %p4524_p8, %p4518_p5 }
  0x17   :  { %4528 = shalt.err (!%p4525_p9)
}
  0x18   :  { %s4559_s22 = smov 192   ;;  %s4560_s23 = smov 12  }
  0x19   :  { %34 = dma.hbm_to_vmem [thread:$0]  %s5214_s1, 1536, %s29_s20, [#allocation9], %s4559_s22, %s4559_s22, %s4560_s23  }
  0x1a   :  { %4549 = dma.done.wait [#allocation6], 256  }
  0x1b   :  { %4550 = vsyncadd [#allocation6], 4294967040 }
  0x1c   :  { %4551 = dma.done.wait [#allocation9], 1536  }
  0x1d   :  { %4552 = vsyncadd [#allocation9], 4294965760  ;;  %vm76_vm0 = vcmask 261120   ;;  %v46_v0 = vld [vmem:[#allocation8 + $0x2c] sm:$0xff]   ;;  %v45_v1 = vld [vmem:[#allocation8 + $0x20] sm:$0xff]   ;;  %s4561_s0 = smov 96  }
  0x1e   :  { %v44_v2 = vld [vmem:[#allocation8 + $0x14] sm:$0xff]   ;;  %v50_v3 = vunpack.c.l.bf16 %v46_v0  ;;  %v43_v5 = vld [vmem:[#allocation8 + $0x8] sm:$0xff]   ;;  %v49_v7 = vunpack.c.l.bf16 %v45_v1  ;;  %v4602_v10 = vld [vmem:[#allocation8 + $0x3c] sm:$0xff]   ;;  %v276_v11 = vunpack.c.h.bf16 %v46_v0  ;;  %v275_v18 = vunpack.c.h.bf16 %v45_v1  ;;  %s4562_s1 = smov 64   ;;  %s4563_s26 = smov 48  }
  0x1f   :  { %v48_v4 = vunpack.c.l.bf16 %v44_v2  ;;  %v51_v6 = vld [vmem:[#allocation5] sm:$0xff]  ;;  %v4598_v8 = vld [vmem:[#allocation8 + $0x48] sm:$0xff]   ;;  %v47_v12 = vunpack.c.l.bf16 %v43_v5  ;;  %v277_v15 = vunpack.c.l.bf16 %v4602_v10  ;;  %v4609_v16 = vld [vmem:[#allocation8] sm:$0xff]   ;;  %v274_v17 = vunpack.c.h.bf16 %v44_v2  ;;  %s4564_s27 = smov 112   ;;  %s4565_s28 = smov 32  }
  0x20   :  { %3861 = vmatprep.mubr.msk.f32.mxu1 %vm76_vm0, %v51_v6  ;;  %v4600_v9 = vld [vmem:[#allocation8 + $0x54] sm:$0xff]   ;;  %70 = vrot.lane.b32.xlu0 %v50_v3, %s4561_s0  ;;  %v278_v13 = vunpack.c.l.bf16 %v4598_v8  ;;  %v272_v21 = vunpack.c.l.bf16 %v4609_v16  ;;  %v273_v22 = vunpack.c.h.bf16 %v43_v5  ;;  %v4614_v23 = vld [vmem:[#allocation8 + $0x48] sm:$0xff]   ;;  %v4628_v32 = vld [vmem:[#allocation8 + $0x3c] sm:$0xff]   ;;  %v782_v1 = vunpack.c.h.bf16 %v4598_v8  ;;  %s4566_s29 = smov 16   ;;  %s4567_s30 = smov 80  }
  0x21   :  { %66 = vrot.lane.b32.xlu1 %v48_v4, %s4561_s0  ;;  %v279_v14 = vunpack.c.l.bf16 %v4600_v9  ;;  %v4240_v20 = vpack.i.bf16 %v276_v11, %v277_v15  ;;  %v4616_v24 = vld [vmem:[#allocation8 + $0x54] sm:$0xff]   ;;  %v4618_v25 = vld [vmem:[#allocation8 + $0x48] sm:$0xff]   ;;  %v4245_v27 = vpack.i.bf16 %v274_v17, %v275_v18  ;;  %v647_v28 = vunpack.c.l.bf16 %v4614_v23  ;;  %v4634_v36 = vld [vmem:[#allocation8 + $0x3c] sm:$0xff]  }
  0x22   :  { %v4620_v26 = vld [vmem:[#allocation8 + $0x54] sm:$0xff]   ;;  %v4250_v29 = vpack.i.bf16 %v272_v21, %v273_v22  ;;  %v648_v30 = vunpack.c.l.bf16 %v4616_v24  ;;  %v512_v33 = vunpack.c.l.bf16 %v4618_v25  ;;  %v646_v38 = vunpack.c.l.bf16 %v4628_v32  ;;  %v4644_v44 = vld [vmem:[#allocation8 + $0x24] sm:$0xff]   ;;  %v634_v52 = vld [vmem:[#allocation8 + $0xc] sm:$0xff]  }
  0x23   :  { %v4235_v19 = vpack.i.bf16 %v278_v13, %v279_v14  ;;  %v4626_v31 = vld [vmem:[#allocation8 + $0x30] sm:$0xff]   ;;  %v513_v34 = vunpack.c.l.bf16 %v4620_v26  ;;  %v4640_v41 = vld [vmem:[#allocation8 + $0x18] sm:$0xff]   ;;  %v511_v43 = vunpack.c.l.bf16 %v4634_v36  ;;  %v4648_v46 = vld [vmem:[#allocation8 + $0x24] sm:$0xff]   ;;  %v644_v49 = vunpack.c.l.bf16 %v4644_v44 }
  0x24   :  { %68 = vrot.lane.b32.xlu0 %v49_v7, %s4561_s0  ;;  %v4632_v35 = vld [vmem:[#allocation8 + $0x30] sm:$0xff]   ;;  %v645_v37 = vunpack.c.l.bf16 %v4626_v31  ;;  %v4255_v39 = vpack.i.bf16 %v647_v28, %v648_v30  ;;  %v4646_v45 = vld [vmem:[#allocation8 + $0x18] sm:$0xff]   ;;  %v643_v48 = vunpack.c.l.bf16 %v4640_v41  ;;  %v4654_v51 = vld [vmem:[#allocation8] sm:$0xff]   ;;  %v509_v54 = vunpack.c.l.bf16 %v4648_v46 }
  0x25   :  { %64 = vrot.lane.b32.xlu1 %v47_v12, %s4561_s0  ;;  %v4260_v40 = vpack.i.bf16 %v512_v33, %v513_v34  ;;  %v510_v42 = vunpack.c.l.bf16 %v4632_v35  ;;  %v508_v53 = vunpack.c.l.bf16 %v4646_v45  ;;  %v4658_v55 = vld [vmem:[#allocation8] sm:$0xff]   ;;  %v4660_v56 = vld [vmem:[#allocation8 + $0xc] sm:$0xff]   ;;  %v641_v57 = vunpack.c.l.bf16 %v4654_v51  ;;  %v909_v61 = vld [vmem:[#allocation8 + $0x48] ss:$12 sps:$4 sm:$0xff]  }
  0x26   :  { %v4265_v47 = vpack.i.bf16 %v645_v37, %v646_v38  ;;  %v642_v58 = vunpack.c.l.bf16 %v634_v52  ;;  %v4275_v59 = vpack.i.bf16 %v643_v48, %v644_v49  ;;  %v506_v62 = vunpack.c.l.bf16 %v4658_v55  ;;  %v4670_v5 = vld [vmem:[#allocation8 + $0x30] sm:$0xff]   ;;  %v908_v6 = vld [vmem:[#allocation8] ss:$60 sps:$4 sm:$0xff]   ;;  %v4698_v38 = vld [vmem:[#allocation8 + $0x48] sm:$0xff]  }
  0x27   :  { %v4270_v50 = vpack.i.bf16 %v510_v42, %v511_v43  ;;  %v4280_v60 = vpack.i.bf16 %v508_v53, %v509_v54  ;;  %v507_v63 = vunpack.c.l.bf16 %v4660_v56  ;;  %v917_v0 = vunpack.c.l.bf16 %v909_v61  ;;  %v4680_v18 = vld [vmem:[#allocation8 + $0x18] sm:$0xff]  }
  0x28   :  { %4236 = vrot.lane.b32.xlu0 %v4235_v19, %s4562_s1  ;;  %v4285_v2 = vpack.i.bf16 %v641_v57, %v642_v58  ;;  %v918_v3 = vunpack.c.h.bf16 %v909_v61  ;;  %v783_v7 = vunpack.c.h.bf16 %v4600_v9  ;;  %v1592_v11 = vunpack.c.h.bf16 %v4618_v25  ;;  %v4682_v19 = vld [vmem:[#allocation8 + $0x24] sm:$0xff]   ;;  %v4710_v48 = vld [vmem:[#allocation8 + $0x3c] sm:$0xff]  }
  0x29   :  { %4241 = vrot.lane.b32.xlu1 %v4240_v20, %s4562_s1  ;;  %v4290_v4 = vpack.i.bf16 %v506_v62, %v507_v63  ;;  %v1593_v12 = vunpack.c.h.bf16 %v4620_v26  ;;  %v915_v13 = vunpack.c.l.bf16 %v4670_v5  ;;  %v916_v14 = vunpack.c.h.bf16 %v908_v6  ;;  %v4718_v54 = vld [vmem:[#allocation8 + $0x18] sm:$0xff]   ;;  %v4720_v57 = vld [vmem:[#allocation8 + $0x24] sm:$0xff]   ;;  %v4730_v63 = vld [vmem:[#allocation8 + $0xc] sm:$0xff]  }
  0x2a   :  { %v4295_v15 = vpack.i.bf16 %v917_v0, %v918_v3  ;;  %v4300_v17 = vpack.i.bf16 %v782_v1, %v783_v7  ;;  %v780_v9 = vunpack.c.h.bf16 %v4626_v31  ;;  %v781_v20 = vunpack.c.h.bf16 %v4602_v10  ;;  %v4728_v62 = vld [vmem:[#allocation8] sm:$0xff]  }
  0x2b   :  { %v4676_v8 = vpack.i.bf16 %v1592_v11, %v1593_v12  ;;  %v913_v21 = vunpack.c.l.bf16 %v4680_v18  ;;  %v914_v22 = vunpack.c.l.bf16 %v4682_v19  ;;  %v4305_v25 = vpack.i.bf16 %v915_v13, %v916_v14  ;;  %v1447_v12 = vld [vmem:[#allocation8 + $0x30] ss:$12 sps:$4 sm:$0xff]  }
  0x2c   :  { %4246 = vrot.lane.b32.xlu0 %v4245_v27, %s4562_s1  ;;  %v4310_v26 = vpack.i.bf16 %v780_v9, %v781_v20  ;;  %v4690_v27 = vld [vmem:[#allocation8 + $0xc] sm:$0xff]   ;;  %v778_v28 = vunpack.c.h.bf16 %v4640_v41  ;;  %v911_v30 = vunpack.c.l.bf16 %v908_v6  ;;  %v776_v34 = vunpack.c.h.bf16 %v4609_v16  ;;  %v1314_v6 = vld [vmem:[#allocation8 + $0x48] ss:$12 sps:$4 sm:$0xff]  }
  0x2d   :  { %4251 = vrot.lane.b32.xlu1 %v4250_v29, %s4562_s1  ;;  %v779_v29 = vunpack.c.h.bf16 %v4644_v44  ;;  %v912_v31 = vunpack.c.l.bf16 %v4690_v27  ;;  %v4315_v10 = vpack.i.bf16 %v913_v21, %v914_v22  ;;  %v777_v37 = vunpack.c.h.bf16 %v634_v52  ;;  %v4708_v16 = vld [vmem:[#allocation8 + $0x30] sm:$0xff]   ;;  %v1445_v22 = vld [vmem:[#allocation8 + $0x18] ss:$12 sps:$4 sm:$0xff]  }
  0x2e   :  { %v1187_v41 = vunpack.c.h.bf16 %v4614_v23  ;;  %v1188_v42 = vunpack.c.h.bf16 %v4616_v24  ;;  %v1052_v44 = vunpack.c.l.bf16 %v4698_v38  ;;  %v1185_v49 = vunpack.c.h.bf16 %v4632_v35 }
  0x2f   :  { %v4320_v33 = vpack.i.bf16 %v778_v28, %v779_v29  ;;  %v4330_v43 = vpack.i.bf16 %v776_v34, %v777_v37  ;;  %v1050_v24 = vunpack.c.l.bf16 %v4708_v16  ;;  %v1051_v53 = vunpack.c.l.bf16 %v4710_v48  ;;  %v1310_v28 = vld [vmem:[#allocation8 + $0x18] ss:$12 sps:$4 sm:$0xff]   ;;  %v1443_v37 = vld [vmem:[#allocation8] ss:$12 sps:$4 sm:$0xff]  }
  0x30   :  { %4256 = vrot.lane.b32.xlu0 %v4255_v39, %s4563_s26  ;;  %v4700_v39 = vld [vmem:[#allocation8 + $0x54] sm:$0xff]   ;;  %v4335_v23 = vpack.i.bf16 %v1187_v41, %v1188_v42  ;;  %v1049_v61 = vunpack.c.l.bf16 %v4720_v57  ;;  %v1181_v0 = vunpack.c.h.bf16 %v4654_v51  ;;  %v1046_v3 = vunpack.c.l.bf16 %v4728_v62 }
  0x31   :  { %4261 = vrot.lane.b32.xlu1 %v4260_v40, %s4564_s27  ;;  %v4325_v40 = vpack.i.bf16 %v911_v30, %v912_v31  ;;  %v4350_v35 = vpack.i.bf16 %v1050_v24, %v1051_v53  ;;  %v1322_v13 = vunpack.c.l.bf16 %v1314_v6  ;;  %v1323_v14 = vunpack.c.h.bf16 %v1314_v6 }
  0x32   :  { %v1456_v9 = vunpack.c.h.bf16 %v1447_v12  ;;  %v1453_v30 = vunpack.c.l.bf16 %v1445_v22  ;;  %v1454_v31 = vunpack.c.h.bf16 %v1445_v22  ;;  %v1319_v34 = vunpack.c.h.bf16 %v1310_v28  ;;  %v161_v22 = vld [vmem:[#allocation8] ss:$12 sps:$4 sm:$0xff]  }
  0x33   :  { %v4380_v21 = vpack.i.bf16 %v1322_v13, %v1323_v14  ;;  %v1451_v41 = vunpack.c.l.bf16 %v1443_v37  ;;  %v1452_v42 = vunpack.c.h.bf16 %v1443_v37  ;;  %v1588_v53 = vunpack.c.h.bf16 %v4680_v18 }
  0x34   :  { %4266 = vrot.lane.b32.xlu0 %v4265_v47, %s4563_s26  ;;  %v1053_v47 = vunpack.c.l.bf16 %v4700_v39  ;;  %v1587_v18 = vunpack.c.h.bf16 %v4690_v27  ;;  %vm179_vm1 = vcmask 523264   ;;  %vm4569_vm2 = vmmov 0  }
  0x35   :  { %4271 = vrot.lane.b32.xlu1 %v4270_v50, %s4564_s27  ;;  %v1186_v50 = vunpack.c.h.bf16 %v4628_v32  ;;  %v1184_v32 = vunpack.c.h.bf16 %v4648_v46  ;;  %v1449_v46 = vld [vmem:[#allocation8 + $0x48] ss:$12 sps:$4 sm:$0xff]   ;;  %vm261_vm3 = vcmask 130048   ;;  %vm2353_vm4 = vcmask 64512  }
  0x36   :  { %v4340_v52 = vpack.i.bf16 %v1052_v44, %v1053_v47  ;;  %v1457_v11 = vunpack.c.l.bf16 %v1449_v46  ;;  %v1458_v51 = vunpack.c.h.bf16 %v1449_v46  ;;  %v1308_v44 = vld [vmem:[#allocation8] ss:$12 sps:$4 sm:$0xff]   ;;  %v4405_v47 = vpack.i.bf16 %v1451_v41, %v1452_v42 }
  0x37   :  { %v4345_v58 = vpack.i.bf16 %v1185_v49, %v1186_v50  ;;  %v1317_v49 = vunpack.c.h.bf16 %v1308_v44  ;;  %v1316_v50 = vunpack.c.l.bf16 %v1308_v44 }
  0x38   :  { %4276 = vrot.lane.b32.xlu0 %v4275_v59, %s4563_s26  ;;  %v1183_v59 = vunpack.c.h.bf16 %v4646_v45  ;;  %v1182_v45 = vunpack.c.h.bf16 %v4660_v56  ;;  %v4375_v20 = vpack.i.bf16 %v1457_v11, %v1458_v51 }
  0x39   :  { %4281 = vrot.lane.b32.xlu1 %v4280_v60, %s4564_s27  ;;  %v1048_v60 = vunpack.c.l.bf16 %v4718_v54 }
  0x3a   :  { %v4355_v1 = vpack.i.bf16 %v1183_v59, %v1184_v32  ;;  %v4365_v7 = vpack.i.bf16 %v1181_v0, %v1182_v45  ;;  %v4760_v59 = vld [vmem:[%s5215_s2] ss:$0 sm:$0xff] }
  0x3c   :  { %4286 = vrot.lane.b32.xlu0 %v4285_v2, %s4563_s26  ;;  %v4360_v2 = vpack.i.bf16 %v1048_v60, %v1049_v61  ;;  %v167_v60 = vld [vmem:[#allocation8 + $0x48] ss:$12 sps:$4 sm:$0xff]   ;;  %v52_v61 = vld [vmem:[#allocation5 + $0x8] sm:$0xff] }
  0x3d   :  { %4291 = vrot.lane.b32.xlu1 %v4290_v4, %s4564_s27  ;;  %v1047_v4 = vunpack.c.l.bf16 %v4730_v63 }
  0x3f   :  { %v4370_v56 = vpack.i.bf16 %v1046_v3, %v1047_v4  ;;  %v165_v3 = vld [vmem:[#allocation8 + $0x30] ss:$12 sps:$4 sm:$0xff]   ;;  %v174_v4 = vunpack.c.l.bf16 %v167_v60 }
  0x40   :  { %4296 = vrot.lane.b32.xlu0 %v4295_v15, %s4561_s0  ;;  %v1312_v15 = vld [vmem:[#allocation8 + $0x30] ss:$12 sps:$4 sm:$0xff]   ;;  %v173_v11 = vunpack.c.h.bf16 %v165_v3 }
  0x41   :  { %4301 = vrot.lane.b32.xlu1 %v4300_v17, %s4564_s27  ;;  %v1455_v17 = vunpack.c.l.bf16 %v1447_v12  ;;  %v172_v12 = vunpack.c.l.bf16 %v165_v3 }
  0x43   :  { %v4385_v29 = vpack.i.bf16 %v1455_v17, %v1456_v9 }
  0x44   :  { %4306 = vrot.lane.b32.xlu0 %v4305_v25, %s4561_s0  ;;  %v1320_v25 = vunpack.c.l.bf16 %v1312_v15 }
  0x45   :  { %4311 = vrot.lane.b32.xlu1 %v4310_v26, %s4564_s27  ;;  %v1321_v26 = vunpack.c.h.bf16 %v1312_v15 }
  0x48   :  { %4316 = vrot.lane.b32.xlu0 %v4315_v10, %s4561_s0  ;;  %v4390_v10 = vpack.i.bf16 %v1320_v25, %v1321_v26  ;;  %v169_v25 = vunpack.c.h.bf16 %v161_v22  ;;  %v168_v26 = vunpack.c.l.bf16 %v161_v22 }
  0x49   :  { %4321 = vrot.lane.b32.xlu1 %v4320_v33, %s4564_s27  ;;  %v1318_v33 = vunpack.c.l.bf16 %v1310_v28 }
  0x4c   :  { %4326 = vrot.lane.b32.xlu0 %v4325_v40, %s4561_s0  ;;  %v4395_v40 = vpack.i.bf16 %v1453_v30, %v1454_v31  ;;  %v411_v30 = vunpack.c.h.bf16 %v4700_v39 }
  0x4d   :  { %4331 = vrot.lane.b32.xlu1 %v4330_v43, %s4564_s27  ;;  %v4400_v43 = vpack.i.bf16 %v1318_v33, %v1319_v34 }
  0x50   :  { %4336 = vrot.lane.b32.xlu0 %v4335_v23, %s4561_s0  ;;  %v1590_v23 = vunpack.c.h.bf16 %v4670_v5  ;;  %v4768_v5 = vld [vmem:[%s5215_s2 + $0x1] ss:$0 sm:$0xff] }
  0x51   :  { %4341 = vrot.lane.b32.xlu1 %v4340_v52, %s4565_s28  ;;  %v1591_v52 = vunpack.c.h.bf16 %v4634_v36 }
  0x53   :  { %v4415_v24 = vpack.i.bf16 %v1590_v23, %v1591_v52 }
  0x54   :  { %4346 = vrot.lane.b32.xlu0 %v4345_v58, %s4561_s0  ;;  %v1589_v58 = vunpack.c.h.bf16 %v4682_v19 }
  0x55   :  { %4351 = vrot.lane.b32.xlu1 %v4350_v35, %s4565_s28 }
  0x56   :  { %v4420_v36 = vpack.i.bf16 %v1588_v53, %v1589_v58  ;;  %v410_v58 = vunpack.c.h.bf16 %v4698_v38  ;;  %v409_v38 = vunpack.c.h.bf16 %v4710_v48  ;;  %v407_v48 = vunpack.c.h.bf16 %v4720_v57 }
  0x57   :  { %v404_v57 = vunpack.c.h.bf16 %v4728_v62 }
  0x58   :  { %4356 = vrot.lane.b32.xlu0 %v4355_v1, %s4561_s0  ;;  %v175_v1 = vunpack.c.h.bf16 %v167_v60 }
  0x59   :  { %4361 = vrot.lane.b32.xlu1 %v4360_v2, %s4565_s28 }
  0x5c   :  { %4366 = vrot.lane.b32.xlu0 %v4365_v7, %s4561_s0 }
  0x5d   :  { %4371 = vrot.lane.b32.xlu1 %v4370_v56, %s4565_s28  ;;  %v163_v56 = vld [vmem:[#allocation8 + $0x18] ss:$12 sps:$4 sm:$0xff]  }
  0x5e   :  { %v171_v15 = vunpack.c.h.bf16 %v163_v56 }
  0x60   :  { %4376 = vrot.lane.b32.xlu0 %v4375_v20, %s4566_s29 }
  0x61   :  { %4381 = vrot.lane.b32.xlu1 %v4380_v21, %s4567_s30  ;;  %v170_v21 = vunpack.c.l.bf16 %v163_v56 }
  0x64   :  { %4386 = vrot.lane.b32.xlu0 %v4385_v29, %s4566_s29 }
  0x65   :  { %4391 = vrot.lane.b32.xlu1 %v4390_v10, %s4567_s30 }
  0x68   :  { %4396 = vrot.lane.b32.xlu0 %v4395_v40, %s4566_s29 }
  0x69   :  { %4401 = vrot.lane.b32.xlu1 %v4400_v43, %s4567_s30 }
  0x6c   :  { %4406 = vrot.lane.b32.xlu0 %v4405_v47, %s4566_s29 }
  0x6d   :  { %1340 = vrot.lane.b32.xlu1 %v1317_v49, %s4567_s30 }
  0x70   :  { %1338 = vrot.lane.b32.xlu0 %v1316_v50, %s4567_s30 }
  0x71   :  { %4411 = vrot.lane.b32.xlu1 %v4676_v8, %s4567_s30  ;;  %v1586_v8 = vunpack.c.h.bf16 %v4658_v55 }
  0x73   :  { %v4425_v19 = vpack.i.bf16 %v1586_v8, %v1587_v18 }
  0x74   :  { %176 = vrot.lane.b32.xlu0 %v4760_v59, %s4562_s1 }
  0x75   :  { %4416 = vrot.lane.b32.xlu1 %v4415_v24, %s4567_s30 }
  0x78   :  { %687 = vrot.lane.b32.xlu0 %v4768_v5, %s4564_s27 }
  0x79   :  { %4421 = vrot.lane.b32.xlu1 %v4420_v36, %s4567_s30 }
  0x7c   :  { %552 = vrot.lane.b32.xlu0 %v4760_v59, %s4563_s26 }
  0x7d   :  { %1092 = vrot.lane.b32.xlu1 %v4768_v5, %s4561_s0 }
  0x80   :  { %4426 = vrot.lane.b32.xlu0 %v4425_v19, %s4567_s30  ;;  %v408_v19 = vunpack.c.h.bf16 %v4708_v16 }
  0x81   :  { %957 = vrot.lane.b32.xlu1 %v4760_v59, %s4565_s28 }
  0x84   :  { %1497 = vrot.lane.b32.xlu0 %v4768_v5, %s4567_s30 }
  0x85   :  { %1362 = vrot.lane.b32.xlu1 %v4760_v59, %s4566_s29 }
  0x92   :  { %v71_v55 = vpop.permute.xlu0 %70 }
  0x93   :  { %v67_v27 = vpop.permute.xlu1 %66  ;;  %3853 = vmatprep.subr.mxu1 %v71_v55 }
  0x94   :  { %3854 = vmatpush3.msra.mxu1 %v71_v55 }
  0x96   :  { %v69_v32 = vpop.permute.xlu0 %68 }
  0x97   :  { %v65_v35 = vpop.permute.xlu1 %64  ;;  %3855 = vmatprep.subr.mxu1 %v69_v32 }
  0x98   :  { %3856 = vmatpush3.msra.mxu1 %v69_v32 }
  0x99   :  { %3857 = vmatprep.subr.mxu1 %v67_v27 }
  0x9a   :  { %3858 = vmatpush3.msra.mxu1 %v67_v27  ;;  %v4237_v0 = vpop.permute.xlu0 %4236 }
  0x9b   :  { %v4242_v45 = vpop.permute.xlu1 %4241  ;;  %3859 = vmatprep.subr.mxu1 %v65_v35  ;;  %v4239_v2 = vunpack.i.h.bf16 %v4237_v0  ;;  %v4238_v46 = vunpack.i.l.bf16 %v4237_v0  ;;  %v405_v0 = vunpack.c.h.bf16 %v4730_v63 }
  0x9c   :  { %3860 = vmatpush3.msra.mxu1 %v65_v35  ;;  %v4243_v6 = vunpack.i.l.bf16 %v4242_v45  ;;  %v4244_v51 = vunpack.i.h.bf16 %v4242_v45  ;;  %v406_v35 = vunpack.c.h.bf16 %v4718_v54 }
  0x9d   :  { %3862 = vmatmul.mubr.msk.f32.vlgmr.msra.gmra.mxu1 %vm76_vm0, %v52_v61  ;;  %3883 = vmatprep.subr.mxu0 %v4238_v46 }
  0x9e   :  { %3884 = vmatpush3.msra.mxu0 %v4238_v46  ;;  %3864 = vmatprep.subr.mxu1 %v175_v1  ;;  %v4247_v7 = vpop.permute.xlu0 %4246 }
  0x9f   :  { %3885 = vmatprep.subr.mxu0 %v4239_v2  ;;  %3865 = vmatpush3.msra.mxu1 %v175_v1  ;;  %v4248_v13 = vunpack.i.l.bf16 %v4247_v7  ;;  %v4252_v14 = vpop.permute.xlu1 %4251  ;;  %v4249_v17 = vunpack.i.h.bf16 %v4247_v7 }
  0xa0   :  { %3886 = vmatpush3.msra.mxu0 %v4239_v2  ;;  %3866 = vmatprep.subr.mxu1 %v174_v4  ;;  %v4253_v9 = vunpack.i.l.bf16 %v4252_v14  ;;  %v4254_v20 = vunpack.i.h.bf16 %v4252_v14 }
  0xa1   :  { %3887 = vmatprep.subr.mxu0 %v4243_v6  ;;  %3867 = vmatpush3.msra.mxu1 %v174_v4 }
  0xa2   :  { %3888 = vmatpush3.msra.mxu0 %v4243_v6  ;;  %3868 = vmatprep.subr.mxu1 %v173_v11  ;;  %v4788_v31 = vpop.permute.xlu0 %4256 }
  0xa3   :  { %3889 = vmatprep.subr.mxu0 %v4244_v51  ;;  %3869 = vmatpush3.msra.mxu1 %v173_v11  ;;  %v4262_v28 = vpop.permute.xlu1 %4261  ;;  %v4258_v1 = vunpack.i.l.bf16 %v4788_v31  ;;  %v4259_v62 = vunpack.i.h.bf16 %v4788_v31 }
  0xa4   :  { %3890 = vmatpush3.msra.mxu0 %v4244_v51  ;;  %3870 = vmatprep.subr.mxu1 %v172_v12  ;;  %v4263_v29 = vunpack.i.l.bf16 %v4262_v28  ;;  %v4264_v36 = vunpack.i.h.bf16 %v4262_v28 }
  0xa5   :  { %3891 = vmatprep.subr.mxu0 %v4248_v13  ;;  %3871 = vmatpush3.msra.mxu1 %v172_v12 }
  0xa6   :  { %3892 = vmatpush3.msra.mxu0 %v4248_v13  ;;  %3872 = vmatprep.subr.mxu1 %v171_v15  ;;  %v4790_v10 = vpop.permute.xlu0 %4266 }
  0xa7   :  { %3893 = vmatprep.subr.mxu0 %v4249_v17  ;;  %3873 = vmatpush3.msra.mxu1 %v171_v15  ;;  %v4272_v34 = vpop.permute.xlu1 %4271  ;;  %v4268_v3 = vunpack.i.l.bf16 %v4790_v10  ;;  %v4269_v11 = vunpack.i.h.bf16 %v4790_v10 }
  0xa8   :  { %3894 = vmatpush3.msra.mxu0 %v4249_v17  ;;  %3874 = vmatprep.subr.mxu1 %v170_v21  ;;  %v4273_v8 = vunpack.i.l.bf16 %v4272_v34  ;;  %v4274_v55 = vunpack.i.h.bf16 %v4272_v34 }
  0xa9   :  { %3895 = vmatprep.subr.mxu0 %v4253_v9  ;;  %3875 = vmatpush3.msra.mxu1 %v170_v21 }
  0xaa   :  { %3896 = vmatpush3.msra.mxu0 %v4253_v9  ;;  %3876 = vmatprep.subr.mxu1 %v169_v25  ;;  %v4792_v33 = vpop.permute.xlu0 %4276 }
  0xab   :  { %3897 = vmatprep.subr.mxu0 %v4254_v20  ;;  %3877 = vmatpush3.msra.mxu1 %v169_v25  ;;  %v4282_v40 = vpop.permute.xlu1 %4281  ;;  %v4278_v51 = vunpack.i.l.bf16 %v4792_v33  ;;  %v4279_v14 = vunpack.i.h.bf16 %v4792_v33 }
  0xac   :  { %3898 = vmatpush3.msra.mxu0 %v4254_v20  ;;  %3878 = vmatprep.subr.mxu1 %v168_v26  ;;  %v4283_v27 = vunpack.i.l.bf16 %v4282_v40  ;;  %v4284_v16 = vunpack.i.h.bf16 %v4282_v40 }
  0xad   :  { %3879 = vmatpush3.msra.mxu1 %v168_v26  ;;  %3921 = vmatprep.subr.mxu0 %v4263_v29 }
  0xae   :  { %3902 = vmatprep.subr.mxu1 %v411_v30  ;;  %v4794_v37 = vpop.permute.xlu0 %4286 }
  0xaf   :  { %v4798_v42 = vpop.permute.xlu1 %4291  ;;  %v4288_v17 = vunpack.i.l.bf16 %v4794_v37  ;;  %v4289_v21 = vunpack.i.h.bf16 %v4794_v37 }
  0xb0   :  { %v4293_v61 = vunpack.i.l.bf16 %v4798_v42  ;;  %v4294_v45 = vunpack.i.h.bf16 %v4798_v42 }
  0xb2   :  { %v4796_v41 = vpop.permute.xlu0 %4296 }
  0xb3   :  { %v4802_v44 = vpop.permute.xlu1 %4301  ;;  %v4298_v26 = vunpack.i.l.bf16 %v4796_v41 }
  0xb4   :  { %v4303_v2 = vunpack.i.l.bf16 %v4802_v44  ;;  %v4304_v4 = vunpack.i.h.bf16 %v4802_v44 }
  0xb6   :  { %v4800_v43 = vpop.permute.xlu0 %4306 }
  0xb7   :  { %v4808_v52 = vpop.permute.xlu1 %4311  ;;  %v4308_v10 = vunpack.i.l.bf16 %v4800_v43  ;;  %v4309_v40 = vunpack.i.h.bf16 %v4800_v43 }
  0xb8   :  { %v4313_v6 = vunpack.i.l.bf16 %v4808_v52  ;;  %v4314_v56 = vunpack.i.h.bf16 %v4808_v52 }
  0xba   :  { %v4805_v50 = vpop.permute.xlu0 %4316 }
  0xbb   :  { %v4828_v18 = vpop.permute.xlu1 %4321 }
  0xbc   :  { %v4323_v12 = vunpack.i.l.bf16 %v4828_v18  ;;  %v4324_v9 = vunpack.i.h.bf16 %v4828_v18 }
  0xbf   :  { %v4837_v60 = vpop.permute.xlu1 %4331 }
  0xc0   :  { %v4333_v20 = vunpack.i.l.bf16 %v4837_v60  ;;  %v4334_v25 = vunpack.i.h.bf16 %v4837_v60 }
  0xc3   :  { %v4847_v63 = vpop.permute.xlu1 %4341 }
  0xc4   :  { %v4343_v28 = vunpack.i.l.bf16 %v4847_v63  ;;  %v4344_v33 = vunpack.i.h.bf16 %v4847_v63 }
  0xc7   :  { %v4863_v7 = vpop.permute.xlu1 %4351 }
  0xc8   :  { %v4353_v34 = vunpack.i.l.bf16 %v4863_v7  ;;  %v4354_v42 = vunpack.i.h.bf16 %v4863_v7 }
  0xcb   :  { %v4872_v15 = vpop.permute.xlu1 %4361 }
  0xcc   :  { %v4363_v44 = vunpack.i.l.bf16 %v4872_v15 }
 0x15d   :  { %v3863_v39 = vpop.f32.mrf.mxu1 }
 0x15e   :  { %v155_v47 = vadd.f32 %v3863_v39, %v4760_v59 }
 0x15f   :  { %v149_v49 = vpop.f32.mrf.mxu1 }
 0x160   :  { %v150_v23 = vadd.f32 %v4760_v59, %v149_v49  ;;  %v4812_v53 = vmax.f32 %v155_v47, 0.0  ;;  %v4823_v59 = vpop.permute.xlu0 %4326  ;;  %v4319_v47 = vunpack.i.h.bf16 %v4805_v50 }
 0x161   :  { %v4328_v49 = vunpack.i.l.bf16 %v4823_v59 }
 0x162   :  { %v4810_v24 = vmax.f32 %v150_v23, 0.0  ;;  %v4364_v23 = vunpack.i.h.bf16 %v4872_v15 }
 0x164   :  { %3880 = vmatprep.mubr.msk.f32.mxu1 %vm179_vm1, %v4810_v24  ;;  %3899 = vmatprep.mubr.msk.f32.mxu0 %vm179_vm1, %v4810_v24  ;;  %v4834_v32 = vpop.permute.xlu0 %4336 }
 0x165   :  { %3881 = vmatmul.mubr.msk.f32.vlgmr.msra.gmra.mxu1 %vm179_vm1, %v4812_v53  ;;  %3900 = vmatmul.mubr.msk.f32.vlgmr.msra.gmra.mxu0 %vm179_vm1, %v4812_v53 }
 0x166   :  { %3903 = vmatpush3.msra.mxu1 %v411_v30  ;;  %3922 = vmatpush3.msra.mxu0 %v4263_v29  ;;  %v4372_v29 = vpop.permute.xlu1 %4371  ;;  %v4299_v30 = vunpack.i.h.bf16 %v4796_v41  ;;  %v4318_v41 = vunpack.i.l.bf16 %v4805_v50 }
 0x167   :  { %3904 = vmatprep.subr.mxu1 %v410_v58  ;;  %3918 = vmatprep.mubr.msk.f32.mxu1 %vm179_vm1, %v4810_v24  ;;  %v4373_v52 = vunpack.i.l.bf16 %v4372_v29 }
 0x168   :  { %3923 = vmatprep.subr.mxu0 %v4264_v36  ;;  %3937 = vmatprep.mubr.msk.f32.mxu0 %vm179_vm1, %v4810_v24  ;;  %v4842_v54 = vpop.permute.xlu0 %4346 }
 0x169   :  { %3905 = vmatpush3.msra.mxu1 %v410_v58  ;;  %3924 = vmatpush3.msra.mxu0 %v4264_v36  ;;  %v4329_v58 = vunpack.i.h.bf16 %v4823_v59  ;;  %v4374_v36 = vunpack.i.h.bf16 %v4372_v29  ;;  %v4339_v59 = vunpack.i.h.bf16 %v4834_v32 }
 0x16a   :  { %3906 = vmatprep.subr.mxu1 %v409_v38  ;;  %3925 = vmatprep.subr.mxu0 %v4273_v8  ;;  %v4897_v37 = vpop.permute.xlu1 %4381 }
 0x16b   :  { %3907 = vmatpush3.msra.mxu1 %v409_v38  ;;  %3926 = vmatpush3.msra.mxu0 %v4273_v8  ;;  %v4338_v8 = vunpack.i.l.bf16 %v4834_v32  ;;  %v4383_v38 = vunpack.i.l.bf16 %v4897_v37 }
 0x16c   :  { %3908 = vmatprep.subr.mxu1 %v408_v19  ;;  %3927 = vmatprep.subr.mxu0 %v4274_v55  ;;  %v4854_v46 = vpop.permute.xlu0 %4356 }
 0x16d   :  { %3909 = vmatpush3.msra.mxu1 %v408_v19  ;;  %3928 = vmatpush3.msra.mxu0 %v4274_v55  ;;  %v4384_v19 = vunpack.i.h.bf16 %v4897_v37 }
 0x16e   :  { %3910 = vmatprep.subr.mxu1 %v407_v48  ;;  %3929 = vmatprep.subr.mxu0 %v4283_v27  ;;  %v4392_v43 = vpop.permute.xlu1 %4391 }
 0x16f   :  { %3911 = vmatpush3.msra.mxu1 %v407_v48  ;;  %3930 = vmatpush3.msra.mxu0 %v4283_v27  ;;  %v4348_v27 = vunpack.i.l.bf16 %v4842_v54  ;;  %v4393_v48 = vunpack.i.l.bf16 %v4392_v43  ;;  %v4394_v60 = vunpack.i.h.bf16 %v4392_v43 }
 0x170   :  { %3912 = vmatprep.subr.mxu1 %v406_v35  ;;  %3931 = vmatprep.subr.mxu0 %v4284_v16  ;;  %v4869_v13 = vpop.permute.xlu0 %4366 }
 0x171   :  { %3913 = vmatpush3.msra.mxu1 %v406_v35  ;;  %3932 = vmatpush3.msra.mxu0 %v4284_v16  ;;  %v4349_v35 = vunpack.i.h.bf16 %v4842_v54  ;;  %v4358_v16 = vunpack.i.l.bf16 %v4854_v46 }
 0x172   :  { %3914 = vmatprep.subr.mxu1 %v405_v0  ;;  %3933 = vmatprep.subr.mxu0 %v4293_v61  ;;  %v4402_v18 = vpop.permute.xlu1 %4401 }
 0x173   :  { %3915 = vmatpush3.msra.mxu1 %v405_v0  ;;  %3934 = vmatpush3.msra.mxu0 %v4293_v61  ;;  %v4403_v61 = vunpack.i.l.bf16 %v4402_v18 }
 0x174   :  { %3916 = vmatprep.subr.mxu1 %v404_v57  ;;  %3935 = vmatprep.subr.mxu0 %v4294_v45  ;;  %v4878_v22 = vpop.permute.xlu0 %4376 }
 0x175   :  { %3917 = vmatpush3.msra.mxu1 %v404_v57  ;;  %3936 = vmatpush3.msra.mxu0 %v4294_v45  ;;  %v4359_v57 = vunpack.i.h.bf16 %v4854_v46  ;;  %v4404_v45 = vunpack.i.h.bf16 %v4402_v18 }
 0x176   :  { %3919 = vmatmul.mubr.msk.f32.vlgmr.msra.gmra.mxu1 %vm179_vm1, %v4812_v53  ;;  %3938 = vmatmul.mubr.msk.f32.vlgmr.msra.gmra.mxu0 %vm179_vm1, %v4812_v53  ;;  %v1341_v32 = vpop.permute.xlu1 %1340 }
 0x177   :  { %3940 = vmatprep.subr.mxu1 %v4258_v1  ;;  %3959 = vmatprep.subr.mxu0 %v4303_v2 }
 0x178   :  { %3941 = vmatpush3.msra.mxu1 %v4258_v1  ;;  %3956 = vmatprep.mubr.msk.f32.mxu1 %vm179_vm1, %v4810_v24  ;;  %v4888_v31 = vpop.permute.xlu0 %4386  ;;  %v4368_v1 = vunpack.i.l.bf16 %v4869_v13 }
 0x179   :  { %3960 = vmatpush3.msra.mxu0 %v4303_v2  ;;  %3975 = vmatprep.mubr.msk.f32.mxu0 %vm179_vm1, %v4810_v24  ;;  %v4369_v2 = vunpack.i.h.bf16 %v4869_v13 }
 0x17a   :  { %3942 = vmatprep.subr.mxu1 %v4259_v62  ;;  %3961 = vmatprep.subr.mxu0 %v4304_v4  ;;  %v4412_v54 = vpop.permute.xlu1 %4411 }
 0x17b   :  { %3943 = vmatpush3.msra.mxu1 %v4259_v62  ;;  %3962 = vmatpush3.msra.mxu0 %v4304_v4  ;;  %v4378_v62 = vunpack.i.l.bf16 %v4878_v22  ;;  %v4413_v46 = vunpack.i.l.bf16 %v4412_v54  ;;  %v4379_v4 = vunpack.i.h.bf16 %v4878_v22 }
 0x17c   :  { %3944 = vmatprep.subr.mxu1 %v4268_v3  ;;  %3963 = vmatprep.subr.mxu0 %v4313_v6  ;;  %v4903_v39 = vpop.permute.xlu0 %4396 }
 0x17d   :  { %3945 = vmatpush3.msra.mxu1 %v4268_v3  ;;  %3964 = vmatpush3.msra.mxu0 %v4313_v6  ;;  %v4414_v6 = vunpack.i.h.bf16 %v4412_v54 }
 0x17e   :  { %3946 = vmatprep.subr.mxu1 %v4269_v11  ;;  %3965 = vmatprep.subr.mxu0 %v4314_v56  ;;  %v4417_v3 = vpop.permute.xlu1 %4416 }
 0x17f   :  { %3947 = vmatpush3.msra.mxu1 %v4269_v11  ;;  %3966 = vmatpush3.msra.mxu0 %v4314_v56  ;;  %v4388_v11 = vunpack.i.l.bf16 %v4888_v31  ;;  %v4419_v13 = vunpack.i.h.bf16 %v4417_v3 }
 0x180   :  { %3948 = vmatprep.subr.mxu1 %v4278_v51  ;;  %3967 = vmatprep.subr.mxu0 %v4323_v12  ;;  %v4909_v50 = vpop.permute.xlu0 %4406 }
 0x181   :  { %3949 = vmatpush3.msra.mxu1 %v4278_v51  ;;  %3968 = vmatpush3.msra.mxu0 %v4323_v12  ;;  %v4418_v51 = vunpack.i.l.bf16 %v4417_v3  ;;  %v4389_v12 = vunpack.i.h.bf16 %v4888_v31  ;;  %v4409_v22 = vunpack.i.h.bf16 %v4909_v50 }
 0x182   :  { %3950 = vmatprep.subr.mxu1 %v4279_v14  ;;  %3969 = vmatprep.subr.mxu0 %v4324_v9  ;;  %v4422_v56 = vpop.permute.xlu1 %4421 }
 0x183   :  { %3951 = vmatpush3.msra.mxu1 %v4279_v14  ;;  %3970 = vmatpush3.msra.mxu0 %v4324_v9  ;;  %v4398_v14 = vunpack.i.l.bf16 %v4903_v39  ;;  %v4423_v15 = vunpack.i.l.bf16 %v4422_v56  ;;  %v4399_v9 = vunpack.i.h.bf16 %v4903_v39 }
 0x184   :  { %3952 = vmatprep.subr.mxu1 %v4288_v17  ;;  %3971 = vmatprep.subr.mxu0 %v4333_v20  ;;  %v1339_v55 = vpop.permute.xlu0 %1338 }
 0x185   :  { %3953 = vmatpush3.msra.mxu1 %v4288_v17  ;;  %3972 = vmatpush3.msra.mxu0 %v4333_v20  ;;  %v4424_v20 = vunpack.i.h.bf16 %v4422_v56 }
 0x186   :  { %3954 = vmatprep.subr.mxu1 %v4289_v21  ;;  %3973 = vmatprep.subr.mxu0 %v4334_v25 }
 0x187   :  { %3955 = vmatpush3.msra.mxu1 %v4289_v21  ;;  %3974 = vmatpush3.msra.mxu0 %v4334_v25 }
 0x188   :  { %3957 = vmatmul.mubr.msk.f32.vlgmr.msra.gmra.mxu1 %vm179_vm1, %v4812_v53  ;;  %3976 = vmatmul.mubr.msk.f32.vlgmr.msra.gmra.mxu0 %vm179_vm1, %v4812_v53  ;;  %v4926_v0 = vpop.permute.xlu0 %176 }
 0x189   :  { %3978 = vmatprep.subr.mxu1 %v4298_v26  ;;  %3997 = vmatprep.subr.mxu0 %v4343_v28 }
 0x18a   :  { %3979 = vmatpush3.msra.mxu1 %v4298_v26  ;;  %3994 = vmatprep.mubr.msk.f32.mxu1 %vm179_vm1, %v4810_v24  ;;  %v4568_v26 = vmov 0.0  }
 0x18b   :  { %3998 = vmatpush3.msra.mxu0 %v4343_v28  ;;  %4013 = vmatprep.mubr.msk.f32.mxu0 %vm179_vm1, %v4810_v24 }
 0x18c   :  { %3980 = vmatprep.subr.mxu1 %v4299_v30  ;;  %3999 = vmatprep.subr.mxu0 %v4344_v33  ;;  %v4931_v63 = vpop.permute.xlu0 %687 }
 0x18d   :  { %3981 = vmatpush3.msra.mxu1 %v4299_v30  ;;  %4000 = vmatpush3.msra.mxu0 %v4344_v33 }
 0x18e   :  { %3982 = vmatprep.subr.mxu1 %v4308_v10  ;;  %4001 = vmatprep.subr.mxu0 %v4353_v34 }
 0x18f   :  { %3983 = vmatpush3.msra.mxu1 %v4308_v10  ;;  %4002 = vmatpush3.msra.mxu0 %v4353_v34 }
 0x190   :  { %3984 = vmatprep.subr.mxu1 %v4309_v40  ;;  %4003 = vmatprep.subr.mxu0 %v4354_v42  ;;  %v4939_v7 = vpop.permute.xlu0 %552 }
 0x191   :  { %3985 = vmatpush3.msra.mxu1 %v4309_v40  ;;  %4004 = vmatpush3.msra.mxu0 %v4354_v42 }
 0x192   :  { %3986 = vmatprep.subr.mxu1 %v4318_v41  ;;  %4005 = vmatprep.subr.mxu0 %v4363_v44 }
 0x193   :  { %3987 = vmatpush3.msra.mxu1 %v4318_v41  ;;  %4006 = vmatpush3.msra.mxu0 %v4363_v44 }
 0x194   :  { %3988 = vmatprep.subr.mxu1 %v4319_v47  ;;  %4007 = vmatprep.subr.mxu0 %v4364_v23  ;;  %v4427_v17 = vpop.permute.xlu0 %4426 }
 0x195   :  { %3989 = vmatpush3.msra.mxu1 %v4319_v47  ;;  %4008 = vmatpush3.msra.mxu0 %v4364_v23  ;;  %v4428_v21 = vunpack.i.l.bf16 %v4427_v17  ;;  %v4429_v25 = vunpack.i.h.bf16 %v4427_v17 }
 0x196   :  { %3990 = vmatprep.subr.mxu1 %v4328_v49  ;;  %4009 = vmatprep.subr.mxu0 %v4373_v52 }
 0x197   :  { %3991 = vmatpush3.msra.mxu1 %v4328_v49  ;;  %4010 = vmatpush3.msra.mxu0 %v4373_v52 }
 0x198   :  { %3992 = vmatprep.subr.mxu1 %v4329_v58  ;;  %4011 = vmatprep.subr.mxu0 %v4374_v36 }
 0x199   :  { %3993 = vmatpush3.msra.mxu1 %v4329_v58  ;;  %4012 = vmatpush3.msra.mxu0 %v4374_v36 }
 0x19a   :  { %3995 = vmatmul.mubr.msk.f32.vlgmr.msra.gmra.mxu1 %vm179_vm1, %v4812_v53  ;;  %4014 = vmatmul.mubr.msk.f32.vlgmr.msra.gmra.mxu0 %vm179_vm1, %v4812_v53 }
 0x19b   :  { %4016 = vmatprep.subr.mxu1 %v4338_v8  ;;  %4035 = vmatprep.subr.mxu0 %v4383_v38 }
 0x19c   :  { %4017 = vmatpush3.msra.mxu1 %v4338_v8  ;;  %4032 = vmatprep.mubr.msk.f32.mxu1 %vm179_vm1, %v4810_v24  ;;  %v1093_v8 = vpop.permute.xlu1 %1092 }
 0x19d   :  { %4036 = vmatpush3.msra.mxu0 %v4383_v38  ;;  %4051 = vmatprep.mubr.msk.f32.mxu0 %vm179_vm1, %v4810_v24 }
 0x19e   :  { %4018 = vmatprep.subr.mxu1 %v4339_v59  ;;  %4037 = vmatprep.subr.mxu0 %v4384_v19 }
 0x19f   :  { %4019 = vmatpush3.msra.mxu1 %v4339_v59  ;;  %4038 = vmatpush3.msra.mxu0 %v4384_v19 }
 0x1a0   :  { %4020 = vmatprep.subr.mxu1 %v4348_v27  ;;  %4039 = vmatprep.subr.mxu0 %v4393_v48 }
 0x1a1   :  { %4021 = vmatpush3.msra.mxu1 %v4348_v27  ;;  %4040 = vmatpush3.msra.mxu0 %v4393_v48  ;;  %v958_v27 = vpop.permute.xlu1 %957 }
 0x1a2   :  { %4022 = vmatprep.subr.mxu1 %v4349_v35  ;;  %4041 = vmatprep.subr.mxu0 %v4394_v60 }
 0x1a3   :  { %4023 = vmatpush3.msra.mxu1 %v4349_v35  ;;  %4042 = vmatpush3.msra.mxu0 %v4394_v60 }
 0x1a4   :  { %4024 = vmatprep.subr.mxu1 %v4358_v16  ;;  %4043 = vmatprep.subr.mxu0 %v4403_v61 }
 0x1a5   :  { %4025 = vmatpush3.msra.mxu1 %v4358_v16  ;;  %4044 = vmatpush3.msra.mxu0 %v4403_v61 }
 0x1a6   :  { %4026 = vmatprep.subr.mxu1 %v4359_v57  ;;  %4045 = vmatprep.subr.mxu0 %v4404_v45 }
 0x1a7   :  { %4027 = vmatpush3.msra.mxu1 %v4359_v57  ;;  %4046 = vmatpush3.msra.mxu0 %v4404_v45 }
 0x1a8   :  { %4028 = vmatprep.subr.mxu1 %v4368_v1  ;;  %4047 = vmatprep.subr.mxu0 %v1341_v32 }
 0x1a9   :  { %4029 = vmatpush3.msra.mxu1 %v4368_v1  ;;  %4048 = vmatpush3.msra.mxu0 %v1341_v32 }
 0x1aa   :  { %4030 = vmatprep.subr.mxu1 %v4369_v2  ;;  %4049 = vmatprep.subr.mxu0 %v1339_v55 }
 0x1ab   :  { %4031 = vmatpush3.msra.mxu1 %v4369_v2  ;;  %4050 = vmatpush3.msra.mxu0 %v1339_v55 }
 0x1ac   :  { %4033 = vmatmul.mubr.msk.f32.vlgmr.msra.gmra.mxu1 %vm179_vm1, %v4812_v53  ;;  %4052 = vmatmul.mubr.msk.f32.vlgmr.msra.gmra.mxu0 %vm179_vm1, %v4812_v53 }
 0x1ad   :  { %4054 = vmatprep.subr.mxu1 %v4378_v62  ;;  %4073 = vmatprep.subr.mxu0 %v4413_v46 }
 0x1ae   :  { %4055 = vmatpush3.msra.mxu1 %v4378_v62  ;;  %4070 = vmatprep.mubr.msk.f32.mxu1 %vm179_vm1, %v4810_v24 }
 0x1af   :  { %4074 = vmatpush3.msra.mxu0 %v4413_v46  ;;  %4089 = vmatprep.mubr.msk.f32.mxu0 %vm179_vm1, %v4810_v24  ;;  %v4408_v24 = vunpack.i.l.bf16 %v4909_v50 }
 0x1b0   :  { %4056 = vmatprep.subr.mxu1 %v4379_v4  ;;  %4075 = vmatprep.subr.mxu0 %v4414_v6 }
 0x1b1   :  { %4057 = vmatpush3.msra.mxu1 %v4379_v4  ;;  %4076 = vmatpush3.msra.mxu0 %v4414_v6 }
 0x1b2   :  { %4058 = vmatprep.subr.mxu1 %v4388_v11  ;;  %4077 = vmatprep.subr.mxu0 %v4418_v51 }
 0x1b3   :  { %4059 = vmatpush3.msra.mxu1 %v4388_v11  ;;  %4078 = vmatpush3.msra.mxu0 %v4418_v51  ;;  %v1498_v11 = vpop.permute.xlu0 %1497 }
 0x1b4   :  { %4060 = vmatprep.subr.mxu1 %v4389_v12  ;;  %4079 = vmatprep.subr.mxu0 %v4419_v13 }
 0x1b5   :  { %4061 = vmatpush3.msra.mxu1 %v4389_v12  ;;  %4080 = vmatpush3.msra.mxu0 %v4419_v13 }
 0x1b6   :  { %4062 = vmatprep.subr.mxu1 %v4398_v14  ;;  %4081 = vmatprep.subr.mxu0 %v4423_v15 }
 0x1b7   :  { %4063 = vmatpush3.msra.mxu1 %v4398_v14  ;;  %4082 = vmatpush3.msra.mxu0 %v4423_v15 }
 0x1b8   :  { %4064 = vmatprep.subr.mxu1 %v4399_v9  ;;  %4083 = vmatprep.subr.mxu0 %v4424_v20 }
 0x1b9   :  { %4065 = vmatpush3.msra.mxu1 %v4399_v9  ;;  %4084 = vmatpush3.msra.mxu0 %v4424_v20 }
 0x1ba   :  { %4066 = vmatprep.subr.mxu1 %v4408_v24  ;;  %4085 = vmatprep.subr.mxu0 %v4428_v21 }
 0x1bb   :  { %4067 = vmatpush3.msra.mxu1 %v4408_v24  ;;  %4086 = vmatpush3.msra.mxu0 %v4428_v21 }
 0x1bc   :  { %4068 = vmatprep.subr.mxu1 %v4409_v22  ;;  %4087 = vmatprep.subr.mxu0 %v4429_v25 }
 0x1bd   :  { %4069 = vmatpush3.msra.mxu1 %v4409_v22  ;;  %4088 = vmatpush3.msra.mxu0 %v4429_v25 }
 0x1be   :  { %4071 = vmatmul.mubr.msk.f32.vlgmr.msra.gmra.mxu1 %vm179_vm1, %v4812_v53  ;;  %4090 = vmatmul.mubr.msk.f32.vlgmr.msra.gmra.mxu0 %vm179_vm1, %v4812_v53 }
 0x1bf   :  { %4092 = vmatprep.subr.mxu1 %v4568_v26  ;;  %4094 = vmatprep.mubr.msk.f32.mxu1 %vm4569_vm2, %v4568_v26 }
 0x1c0   :  { %4102 = vmatprep.subr.mxu0 %v4568_v26  ;;  %4104 = vmatprep.mubr.msk.f32.mxu0 %vm4569_vm2, %v4568_v26 }
 0x225   :  { %v3882_v28 = vpop.f32.mrf.mxu1  ;;  %v3901_v29 = vpop.f32.mrf.mxu0 }
 0x226   :  { %v258_v30 = vadd.f32 %v3882_v28, %v4926_v0  ;;  %v391_v31 = vadd.f32 %v3901_v29, %v4768_v5 }
 0x227   :  { %v252_v53 = vpop.f32.mrf.mxu1  ;;  %v385_v10 = vpop.f32.mrf.mxu0 }
 0x228   :  { %263 = vst.msk [vmem:[#allocation2 + $0x8] sm:$0xff] %vm261_vm3, %v258_v30  ;;  %395 = vst.msk [vmem:[#allocation3 + $0x8] sm:$0xff] %vm261_vm3, %v391_v31  ;;  %v253_v33 = vadd.f32 %v252_v53, %v4926_v0  ;;  %v386_v34 = vadd.f32 %v4768_v5, %v385_v10 }
 0x22a   :  { %262 = vst.msk [vmem:[#allocation2] sm:$0xff] %vm261_vm3, %v253_v33  ;;  %394 = vst.msk [vmem:[#allocation3] sm:$0xff] %vm261_vm3, %v386_v34 }
 0x22f   :  { %v1722_v41 = vld [vmem:[#allocation3 + $0x8] sm:$0xff] }
 0x230   :  { %v1714_v39 = vld [vmem:[#allocation2 + $0x8] sm:$0xff] }
 0x231   :  { %v1721_v37 = vld [vmem:[#allocation3] sm:$0xff] }
 0x232   :  { %4093 = vmatpush3.xpose.msk.msra.mxu1 %vm261_vm3, %v1721_v37  ;;  %v1713_v40 = vld [vmem:[#allocation2] sm:$0xff] }
 0x233   :  { %4097 = vmatprep.subr.mxu1 %v4568_v26 }
 0x235   :  { %4095 = vmatmul.mubr.msk.f32.vlgmr.msra.gmra.mxu1 %vm261_vm3, %v1713_v40 }
 0x236   :  { %v3939_v42 = vpop.f32.mrf.mxu0  ;;  %4098 = vmatpush3.xpose.msk.msra.mxu1 %vm261_vm3, %v1722_v41  ;;  %4099 = vmatprep.mubr.msk.f32.mxu1 %vm4569_vm2, %v4568_v26  ;;  %v4983_v43 = vpop.f32.mrf.mxu1 }
 0x237   :  { %v627_v5 = vadd.f32 %v3939_v42, %v4939_v7  ;;  %4107 = vmatprep.subr.mxu1 %v4568_v26 }
 0x238   :  { %v621_v44 = vpop.f32.mrf.mxu0  ;;  %v4985_v49 = vpop.f32.mrf.mxu1 }
 0x239   :  { %632 = vst.msk [vmem:[#allocation2 + $0x18] sm:$0xff] %vm261_vm3, %v627_v5  ;;  %v622_v47 = vadd.f32 %v621_v44, %v4939_v7  ;;  %4100 = vmatmul.mubr.msk.f32.vlgmr.msra.gmra.mxu1 %vm261_vm3, %v1714_v39 }
 0x23a   :  { %4109 = vmatprep.mubr.msk.f32.mxu1 %vm4569_vm2, %v4568_v26 }
 0x23b   :  { %631 = vst.msk [vmem:[#allocation2 + $0x10] sm:$0xff] %vm261_vm3, %v622_v47 }
 0x240   :  { %v1716_v59 = vld [vmem:[#allocation2 + $0x18] sm:$0xff] }
 0x242   :  { %v1715_v19 = vld [vmem:[#allocation2 + $0x10] sm:$0xff] }
 0x248   :  { %v3958_v23 = vpop.f32.mrf.mxu1  ;;  %v4992_v38 = vpop.f32.mrf.mxu0 }
 0x249   :  { %v762_v52 = vadd.f32 %v3958_v23, %v4931_v63 }
 0x24a   :  { %v756_v58 = vpop.f32.mrf.mxu1  ;;  %v5000_v55 = vpop.f32.mrf.mxu0 }
 0x24b   :  { %767 = vst.msk [vmem:[#allocation3 + $0x18] sm:$0xff] %vm261_vm3, %v762_v52  ;;  %v757_v50 = vadd.f32 %v756_v58, %v4931_v63  ;;  %v1363_v63 = vpop.permute.xlu1 %1362 }
 0x24d   :  { %766 = vst.msk [vmem:[#allocation3 + $0x10] sm:$0xff] %vm261_vm3, %v757_v50 }
 0x252   :  { %v1724_v36 = vld [vmem:[#allocation3 + $0x18] sm:$0xff] }
 0x253   :  { %4108 = vmatpush3.xpose.msk.msra.mxu1 %vm261_vm3, %v1724_v36 }
 0x254   :  { %v1723_v18 = vld [vmem:[#allocation3 + $0x10] sm:$0xff]  ;;  %4117 = vmatprep.subr.mxu1 %v4568_v26 }
 0x255   :  { %4103 = vmatpush3.xpose.msk.msra.mxu0 %vm261_vm3, %v1723_v18 }
 0x256   :  { %4110 = vmatmul.mubr.msk.f32.vlgmr.msra.gmra.mxu1 %vm261_vm3, %v1716_v59  ;;  %4112 = vmatprep.subr.mxu0 %v4568_v26 }
 0x257   :  { %4119 = vmatprep.mubr.msk.f32.mxu1 %vm4569_vm2, %v4568_v26 }
 0x258   :  { %4105 = vmatmul.mubr.msk.f32.vlgmr.msra.gmra.mxu0 %vm261_vm3, %v1715_v19 }
 0x259   :  { %4114 = vmatprep.mubr.msk.f32.mxu0 %vm4569_vm2, %v4568_v26 }
 0x25a   :  { %v3996_v48 = vpop.f32.mrf.mxu1  ;;  %v4015_v32 = vpop.f32.mrf.mxu0 }
 0x25b   :  { %v1032_v35 = vadd.f32 %v3996_v48, %v958_v27  ;;  %v1167_v60 = vadd.f32 %v4015_v32, %v1093_v8 }
 0x25c   :  { %v1026_v16 = vpop.f32.mrf.mxu1  ;;  %v1161_v61 = vpop.f32.mrf.mxu0 }
 0x25d   :  { %1037 = vst.msk [vmem:[#allocation2 + $0x28] sm:$0xff] %vm261_vm3, %v1032_v35  ;;  %1172 = vst.msk [vmem:[#allocation3 + $0x28] sm:$0xff] %vm261_vm3, %v1167_v60  ;;  %v1027_v0 = vadd.f32 %v1026_v16, %v958_v27  ;;  %v1162_v57 = vadd.f32 %v1161_v61, %v1093_v8  ;;  %v5055_v60 = vld [vmem:[%s5215_s2 + $0x1] ss:$0 sm:$0xff] }
 0x25f   :  { %1036 = vst.msk [vmem:[#allocation2 + $0x20] sm:$0xff] %vm261_vm3, %v1027_v0  ;;  %1171 = vst.msk [vmem:[#allocation3 + $0x20] sm:$0xff] %vm261_vm3, %v1162_v57 }
 0x264   :  { %v1726_v45 = vld [vmem:[#allocation3 + $0x28] sm:$0xff] }
 0x265   :  { %4118 = vmatpush3.xpose.msk.msra.mxu1 %vm261_vm3, %v1726_v45  ;;  %v1718_v1 = vld [vmem:[#allocation2 + $0x28] sm:$0xff] }
 0x266   :  { %v1725_v54 = vld [vmem:[#allocation3 + $0x20] sm:$0xff]  ;;  %4127 = vmatprep.subr.mxu1 %v4568_v26 }
 0x267   :  { %4113 = vmatpush3.xpose.msk.msra.mxu0 %vm261_vm3, %v1725_v54  ;;  %v1717_v2 = vld [vmem:[#allocation2 + $0x20] sm:$0xff] }
 0x268   :  { %4120 = vmatmul.mubr.msk.f32.vlgmr.msra.gmra.mxu1 %vm261_vm3, %v1718_v1  ;;  %4122 = vmatprep.subr.mxu0 %v4568_v26 }
 0x269   :  { %4129 = vmatprep.mubr.msk.f32.mxu1 %vm4569_vm2, %v4568_v26 }
 0x26a   :  { %4115 = vmatmul.mubr.msk.f32.vlgmr.msra.gmra.mxu0 %vm261_vm3, %v1717_v2 }
 0x26b   :  { %4124 = vmatprep.mubr.msk.f32.mxu0 %vm4569_vm2, %v4568_v26 }
 0x26c   :  { %v4053_v62 = vpop.f32.mrf.mxu0  ;;  %v5021_v6 = vpop.f32.mrf.mxu1 }
 0x26d   :  { %v1437_v46 = vadd.f32 %v4053_v62, %v1363_v63 }
 0x26e   :  { %v1431_v3 = vpop.f32.mrf.mxu0  ;;  %v5023_v7 = vpop.f32.mrf.mxu1 }
 0x26f   :  { %1442 = vst.msk [vmem:[#allocation2 + $0x38] sm:$0xff] %vm261_vm3, %v1437_v46  ;;  %v1432_v4 = vadd.f32 %v1431_v3, %v1363_v63 }
 0x271   :  { %1441 = vst.msk [vmem:[#allocation2 + $0x30] sm:$0xff] %vm261_vm3, %v1432_v4 }
 0x276   :  { %v1720_v17 = vld [vmem:[#allocation2 + $0x38] sm:$0xff] }
 0x278   :  { %v1719_v9 = vld [vmem:[#allocation2 + $0x30] sm:$0xff] }
 0x27e   :  { %v4072_v51 = vpop.f32.mrf.mxu1  ;;  %v5039_v31 = vpop.f32.mrf.mxu0 }
 0x27f   :  { %v1572_v56 = vadd.f32 %v4072_v51, %v1498_v11 }
 0x280   :  { %v1566_v12 = vpop.f32.mrf.mxu1  ;;  %v5041_v53 = vpop.f32.mrf.mxu0 }
 0x281   :  { %1577 = vst.msk [vmem:[#allocation3 + $0x38] sm:$0xff] %vm261_vm3, %v1572_v56  ;;  %v1567_v13 = vadd.f32 %v1566_v12, %v1498_v11 }
 0x283   :  { %1576 = vst.msk [vmem:[#allocation3 + $0x30] sm:$0xff] %vm261_vm3, %v1567_v13 }
 0x288   :  { %v1728_v14 = vld [vmem:[#allocation3 + $0x38] sm:$0xff] }
 0x289   :  { %4128 = vmatpush3.xpose.msk.msra.mxu1 %vm261_vm3, %v1728_v14 }
 0x28a   :  { %v1727_v15 = vld [vmem:[#allocation3 + $0x30] sm:$0xff]  ;;  %4137 = vmatprep.subr.mxu1 %v4568_v26 }
 0x28b   :  { %4123 = vmatpush3.xpose.msk.msra.mxu0 %vm261_vm3, %v1727_v15 }
 0x28c   :  { %4130 = vmatmul.mubr.msk.f32.vlgmr.msra.gmra.mxu1 %vm261_vm3, %v1720_v17  ;;  %4132 = vmatprep.subr.mxu0 %v4568_v26 }
 0x28d   :  { %4139 = vmatprep.mubr.msk.f32.mxu1 %vm4569_vm2, %v4568_v26 }
 0x28e   :  { %4125 = vmatmul.mubr.msk.f32.vlgmr.msra.gmra.mxu0 %vm261_vm3, %v1719_v9 }
 0x28f   :  { %4134 = vmatprep.mubr.msk.f32.mxu0 %vm4569_vm2, %v4568_v26 }
 0x2f5   :  { %v1809_v20 = vpop.f32.mrf.mxu1 }
 0x2f6   :  { %v2345_v24 = vmul.f32 0.25, %v1809_v20 }
 0x2f7   :  { %v4096_v21 = vpop.f32.mrf.mxu1 }
 0x2f8   :  { %v2354_v22 = vsel %vm2353_vm4, %v2345_v24, -inf }
 0x2f9   :  { %2355 = vmax.xlane.f32.xlu0 %v2354_v22  ;;  %v1885_v25 = vpop.f32.mrf.mxu1 }
 0x2fa   :  { %v2346_v28 = vmul.f32 0.25, %v1885_v25 }
 0x2fb   :  { %v4101_v29 = vpop.f32.mrf.mxu1 }
 0x2fc   :  { %v2357_v30 = vsel %vm2353_vm4, %v2346_v28, -inf }
 0x2fd   :  { %2358 = vmax.xlane.f32.xlu1 %v2357_v30 }
 0x316   :  { %v2037_v10 = vpop.f32.mrf.mxu1 }
 0x317   :  { %v2348_v41 = vmul.f32 0.25, %v2037_v10 }
 0x318   :  { %v1961_v33 = vpop.f32.mrf.mxu0  ;;  %v4111_v34 = vpop.f32.mrf.mxu1 }
 0x319   :  { %v2347_v37 = vmul.f32 0.25, %v1961_v33  ;;  %v2363_v5 = vsel %vm2353_vm4, %v2348_v41, -inf }
 0x31a   :  { %v4106_v40 = vpop.f32.mrf.mxu0 }
 0x31b   :  { %v2360_v42 = vsel %vm2353_vm4, %v2347_v37, -inf }
 0x31c   :  { %2361 = vmax.xlane.f32.xlu0 %v2360_v42 }
 0x320   :  { %2364 = vmax.xlane.f32.xlu0 %v2363_v5 }
 0x328   :  { %v2189_v44 = vpop.f32.mrf.mxu1 }
 0x329   :  { %v2350_v39 = vmul.f32 0.25, %v2189_v44 }
 0x32a   :  { %v2113_v47 = vpop.f32.mrf.mxu0  ;;  %v4121_v23 = vpop.f32.mrf.mxu1 }
 0x32b   :  { %v2349_v52 = vmul.f32 0.25, %v2113_v47  ;;  %v2369_v58 = vsel %vm2353_vm4, %v2350_v39, -inf }
 0x32c   :  { %v4116_v50 = vpop.f32.mrf.mxu0  ;;  %2370 = vmax.xlane.f32.xlu0 %v2369_v58  ;;  %v5102_v58 = vld [vmem:[#allocation8 + $0x4] sm:$0xff]  }
 0x32d   :  { %v2366_v36 = vsel %vm2353_vm4, %v2349_v52, -inf  ;;  %v5104_v50 = vld [vmem:[#allocation8 + $0x10] sm:$0xff]  }
 0x32e   :  { %2367 = vmax.xlane.f32.xlu1 %v2366_v36  ;;  %v3028_v36 = vunpack.c.l.bf16 %v5102_v58 }
 0x34c   :  { %v2341_v8 = vpop.f32.mrf.mxu1 }
 0x34d   :  { %v2352_v18 = vmul.f32 0.25, %v2341_v8  ;;  %v3029_v8 = vunpack.c.l.bf16 %v5104_v50 }
 0x34e   :  { %v2265_v59 = vpop.f32.mrf.mxu0  ;;  %v4131_v19 = vpop.f32.mrf.mxu1 }
 0x34f   :  { %v5047_v27 = vmul.f32 0.25, %v2265_v59  ;;  %v2375_v48 = vsel %vm2353_vm4, %v2352_v18, -inf  ;;  %v5111_v59 = vld [vmem:[#allocation8 + $0x1c] sm:$0xff]   ;;  %v5113_v19 = vld [vmem:[#allocation8 + $0x28] sm:$0xff]  }
 0x350   :  { %v4126_v32 = vpop.f32.mrf.mxu0  ;;  %2376 = vmax.xlane.f32.xlu0 %v2375_v48  ;;  %v3032_v48 = vunpack.c.l.bf16 %v5111_v59 }
 0x351   :  { %v2372_v35 = vsel %vm2353_vm4, %v5047_v27, -inf  ;;  %v3033_v32 = vunpack.c.l.bf16 %v5113_v19 }
 0x352   :  { %2373 = vmax.xlane.f32.xlu1 %v2372_v35  ;;  %v5119_v35 = vld [vmem:[#allocation8 + $0x40] sm:$0xff]  }
 0x363   :  { %418 = vrot.lane.b32.xlu1 %v5055_v60, %s4562_s1 }
 0x382   :  { %v2356_v16 = vpop.xlane.xlu0 %2355 }
 0x383   :  { %v2378_v61 = vsub.f32 %v2345_v24, %v2356_v16 }
 0x385   :  { %v2386_v0 = vmul.f32 1.442695, %v2378_v61  ;;  %v5122_v61 = vld [vmem:[#allocation8 + $0x58] sm:$0xff]  }
 0x386   :  { %v2359_v57 = vpop.xlane.xlu1 %2358 }
 0x387   :  { %4445 = vpow2.f32 %v2386_v0  ;;  %v2379_v45 = vsub.f32 %v2346_v28, %v2359_v57  ;;  %v3310_v0 = vunpack.c.l.bf16 %v5122_v61  ;;  %v4430_v57 = vpack.i.bf16 %v3032_v48, %v3033_v32 }
 0x389   :  { %v2388_v54 = vmul.f32 1.442695, %v2379_v45 }
 0x38b   :  { %4447 = vpow2.f32 %v2388_v54 }
 0x394   :  { %v5059_v1 = vpop.eup %4445 }
 0x395   :  { %v2402_v2 = vsel %vm2353_vm4, %v5059_v1, 0.0 }
 0x396   :  { %2403 = vadd.xlane.f32.xlu1 %v2402_v2  ;;  %v5128_v2 = vld [vmem:[#allocation8 + $0x4c] sm:$0xff]  }
 0x398   :  { %v5063_v63 = vpop.eup %4447 }
 0x399   :  { %v2405_v62 = vsel %vm2353_vm4, %v5063_v63, 0.0 }
 0x39a   :  { %2406 = vadd.xlane.f32.xlu0 %v2405_v62 }
 0x3a5   :  { %v2362_v46 = vpop.xlane.xlu0 %2361 }
 0x3a6   :  { %v2380_v3 = vsub.f32 %v2347_v37, %v2362_v46  ;;  %v3309_v46 = vunpack.c.l.bf16 %v5128_v2 }
 0x3a8   :  { %v2390_v4 = vmul.f32 1.442695, %v2380_v3 }
 0x3a9   :  { %v2365_v11 = vpop.xlane.xlu0 %2364 }
 0x3aa   :  { %4449 = vpow2.f32 %v2390_v4  ;;  %v2381_v51 = vsub.f32 %v2348_v41, %v2365_v11 }
 0x3ac   :  { %v2392_v56 = vmul.f32 1.442695, %v2381_v51 }
 0x3ae   :  { %4451 = vpow2.f32 %v2392_v56 }
 0x3b5   :  { %v2371_v12 = vpop.xlane.xlu0 %2370 }
 0x3b6   :  { %v2383_v13 = vsub.f32 %v2350_v39, %v2371_v12 }
 0x3b7   :  { %v5067_v14 = vpop.eup %4449  ;;  %v2368_v15 = vpop.xlane.xlu1 %2367 }
 0x3b8   :  { %v2396_v17 = vmul.f32 1.442695, %v2383_v13  ;;  %v2382_v9 = vsub.f32 %v2349_v52, %v2368_v15  ;;  %v2408_v20 = vsel %vm2353_vm4, %v5067_v14, 0.0 }
 0x3b9   :  { %2409 = vadd.xlane.f32.xlu1 %v2408_v20 }
 0x3ba   :  { %4453 = vpow2.f32 %v2396_v17  ;;  %v2394_v24 = vmul.f32 1.442695, %v2382_v9 }
 0x3bb   :  { %v5071_v21 = vpop.eup %4451 }
 0x3bc   :  { %4455 = vpow2.f32 %v2394_v24  ;;  %v2411_v22 = vsel %vm2353_vm4, %v5071_v21, 0.0 }
 0x3bd   :  { %2412 = vadd.xlane.f32.xlu0 %v2411_v22 }
 0x3c7   :  { %v5075_v25 = vpop.eup %4453 }
 0x3c8   :  { %v2417_v28 = vsel %vm2353_vm4, %v5075_v25, 0.0 }
 0x3c9   :  { %v5079_v29 = vpop.eup %4455  ;;  %2418 = vadd.xlane.f32.xlu0 %v2417_v28 }
 0x3ca   :  { %v2414_v30 = vsel %vm2353_vm4, %v5079_v29, 0.0 }
 0x3cb   :  { %2415 = vadd.xlane.f32.xlu1 %v2414_v30 }
 0x3d9   :  { %v2377_v10 = vpop.xlane.xlu0 %2376 }
 0x3da   :  { %v2385_v33 = vsub.f32 %v2352_v18, %v2377_v10  ;;  %v4435_v18 = vpack.i.bf16 %v3028_v36, %v3029_v8 }
 0x3db   :  { %v2374_v34 = vpop.xlane.xlu1 %2373 }
 0x3dc   :  { %v2400_v37 = vmul.f32 1.442695, %v2385_v33  ;;  %1227 = vrot.lane.b32.xlu1 %v5055_v60, %s4565_s28  ;;  %v2384_v5 = vsub.f32 %v5047_v27, %v2374_v34  ;;  %v5115_v27 = vld [vmem:[#allocation8 + $0x34] sm:$0xff]  }
 0x3dd   :  { %v3214_v16 = vunpack.c.l.bf16 %v5115_v27 }
 0x3de   :  { %4457 = vpow2.f32 %v2400_v37  ;;  %v2398_v23 = vmul.f32 1.442695, %v2384_v5 }
 0x3df   :  { %v419_v40 = vpop.permute.xlu1 %418 }
 0x3e0   :  { %v488_v41 = vadd.f32 %v4985_v49, %v419_v40  ;;  %v493_v42 = vadd.f32 %v4983_v43, %v419_v40  ;;  %4459 = vpow2.f32 %v2398_v23 }
 0x3e2   :  { %496 = vst.msk [vmem:[#allocation4] sm:$0xff] %vm261_vm3, %v488_v41  ;;  %497 = vst.msk [vmem:[#allocation4 + $0x8] sm:$0xff] %vm261_vm3, %v493_v42 }
 0x3e9   :  { %v1729_v44 = vld [vmem:[#allocation4] sm:$0xff]  ;;  %v1730_v39 = vld [vmem:[#allocation4 + $0x8] sm:$0xff] }
 0x3ea   :  { %4133 = vmatpush3.msra.mxu0 %v1729_v44  ;;  %4138 = vmatpush3.msra.mxu1 %v1730_v39 }
 0x3eb   :  { %v5090_v47 = vpop.eup %4457  ;;  %4142 = vmatprep.subr.mxu0 %v4568_v26  ;;  %4147 = vmatprep.subr.mxu1 %v4568_v26 }
 0x3ec   :  { %v2423_v43 = vsel %vm2353_vm4, %v5090_v47, 0.0 }
 0x3ed   :  { %2424 = vadd.xlane.f32.xlu0 %v2423_v43  ;;  %v5096_v49 = vpop.eup %4459 }
 0x3ee   :  { %v2420_v52 = vsel %vm2353_vm4, %v5096_v49, 0.0 }
 0x400   :  { %2421 = vadd.xlane.f32.xlu1 %v2420_v52 }
 0x403   :  { %822 = vrot.lane.b32.xlu0 %v5055_v60, %s4563_s26 }
 0x407   :  { %4431 = vrot.lane.b32.xlu0 %v4430_v57, %s4562_s1 }
 0x411   :  { %1632 = vrot.lane.b32.xlu1 %v5055_v60, %s4566_s29  ;;  %v3215_v60 = vunpack.c.l.bf16 %v5119_v35 }
 0x413   :  { %v4440_v54 = vpack.i.bf16 %v3214_v16, %v3215_v60 }
 0x415   :  { %4436 = vrot.lane.b32.xlu1 %v4435_v18, %s4562_s1  ;;  %4441 = vrot.lane.b32.xlu0 %v4440_v54, %s4562_s1 }
 0x419   :  { %3315 = vrot.lane.b32.xlu1 %v3310_v0, %s4562_s1  ;;  %3313 = vrot.lane.b32.xlu0 %v3309_v46, %s4562_s1 }
 0x41f   :  { %v2404_v45 = vpop.xlane.xlu1 %2403 }
 0x420   :  { %4461 = vrcp.f32 %v2404_v45 }
 0x423   :  { %v2407_v62 = vpop.xlane.xlu0 %2406 }
 0x424   :  { %4463 = vrcp.f32 %v2407_v62 }
 0x42d   :  { %v4462_v3 = vpop.eup %4461 }
 0x42e   :  { %v2434_v4 = vmul.f32 %v4462_v3, %v5059_v1 }
 0x430   :  { %4135 = vmatmul.mubr.msk.f32.vlgmr.msra.gmra.mxu0 %vm2353_vm4, %v2434_v4 }
 0x431   :  { %v4464_v11 = vpop.eup %4463  ;;  %4144 = vmatprep.mubr.msk.f32.mxu0 %vm4569_vm2, %v4568_v26 }
 0x432   :  { %v2435_v51 = vmul.f32 %v4464_v11, %v5063_v63 }
 0x434   :  { %4140 = vmatmul.mubr.msk.f32.vlgmr.msra.gmra.mxu1 %vm2353_vm4, %v2435_v51 }
 0x435   :  { %4149 = vmatprep.mubr.msk.f32.mxu1 %vm4569_vm2, %v4568_v26 }
 0x442   :  { %v2410_v56 = vpop.xlane.xlu1 %2409 }
 0x443   :  { %4465 = vrcp.f32 %v2410_v56 }
 0x446   :  { %v2413_v17 = vpop.xlane.xlu0 %2412 }
 0x447   :  { %4467 = vrcp.f32 %v2413_v17  ;;  %v3425_v17 = vunpack.c.h.bf16 %v5128_v2  ;;  %v3419_v2 = vunpack.c.h.bf16 %v5102_v58 }
 0x452   :  { %v2419_v9 = vpop.xlane.xlu0 %2418 }
 0x453   :  { %4469 = vrcp.f32 %v2419_v9  ;;  %v3424_v9 = vunpack.c.h.bf16 %v5119_v35  ;;  %v3421_v35 = vunpack.c.h.bf16 %v5111_v59 }
 0x454   :  { %v2416_v12 = vpop.xlane.xlu1 %2415 }
 0x455   :  { %4471 = vrcp.f32 %v2416_v12 }
 0x458   :  { %v1228_v13 = vpop.permute.xlu1 %1227 }
 0x459   :  { %v1297_v15 = vadd.f32 %v5023_v7, %v1228_v13  ;;  %v1302_v1 = vadd.f32 %v5021_v6, %v1228_v13  ;;  %v4466_v6 = vpop.eup %4465 }
 0x45a   :  { %v4468_v7 = vpop.eup %4467  ;;  %v2436_v33 = vmul.f32 %v4466_v6, %v5067_v14 }
 0x45b   :  { %1306 = vst.msk [vmem:[#allocation4 + $0x20] sm:$0xff] %vm261_vm3, %v1297_v15  ;;  %1307 = vst.msk [vmem:[#allocation4 + $0x28] sm:$0xff] %vm261_vm3, %v1302_v1  ;;  %v2437_v34 = vmul.f32 %v4468_v7, %v5071_v21  ;;  %v3426_v1 = vunpack.c.h.bf16 %v5122_v61  ;;  %v3422_v61 = vunpack.c.h.bf16 %v5113_v19 }
 0x460   :  { %v4470_v28 = vpop.eup %4469 }
 0x461   :  { %v2439_v21 = vmul.f32 %v4470_v28, %v5075_v25 }
 0x462   :  { %v4472_v37 = vpop.eup %4471 }
 0x463   :  { %v2438_v14 = vmul.f32 %v4472_v37, %v5079_v29 }
 0x476   :  { %v2425_v63 = vpop.xlane.xlu0 %2424 }
 0x477   :  { %4473 = vrcp.f32 %v2425_v63  ;;  %v3423_v63 = vunpack.c.h.bf16 %v5115_v27  ;;  %v3420_v27 = vunpack.c.h.bf16 %v5104_v50 }
 0x47a   :  { %v823_v20 = vpop.permute.xlu0 %822 }
 0x47b   :  { %v892_v24 = vadd.f32 %v5000_v55, %v823_v20  ;;  %v897_v22 = vadd.f32 %v4992_v38, %v823_v20  ;;  %v1733_v38 = vld [vmem:[#allocation4 + $0x20] sm:$0xff]  ;;  %v1734_v55 = vld [vmem:[#allocation4 + $0x28] sm:$0xff] }
 0x47c   :  { %v3666_v20 = vld [vmem:[%s5215_s2 + $0x2] ss:$0 sm:$0xff]  ;;  %s4570_s2 = smov [#allocation10]  }
 0x47d   :  { %901 = vst.msk [vmem:[#allocation4 + $0x10] sm:$0xff] %vm261_vm3, %v892_v24  ;;  %902 = vst.msk [vmem:[#allocation4 + $0x18] sm:$0xff] %vm261_vm3, %v897_v22  ;;  %3427 = vrot.lane.b32.xlu1 %v3666_v20, %s4562_s1  ;;  %3513 = vrot.lane.b32.xlu0 %v3666_v20, %s4565_s28  ;;  %s3586_s12 = sshll.u32 %s4570_s2, 4  ;;  %s3587_s12 = int_to_ptr.vmem [resolvable:$true] %s3586_s12 }
 0x47e   :  { %v4432_v5 = vpop.permute.xlu0 %4431  ;;  %s4529_s13 = scalar_lea.vmem %s3587_s12, 16  ;;  %s4533_s14 = scalar_lea.vmem %s3587_s12, 32 }
 0x47f   :  { %v4434_v18 = vunpack.i.h.bf16 %v4432_v5  ;;  %p4530_p10 = scmp.ne.s32.totalorder %s3587_s12, %s4529_s13  ;;  %p4534_p11 = scmp.lt.s32.totalorder %s3587_s12, %s3587_s12 }
 0x480   :  { %p4535_p12 = scmp.lt.s32.totalorder %s4533_s14, %s4529_s13 }
 0x482   :  { %p4536_p13 = por %p4535_p12, %p4534_p11 }
 0x484   :  { %v1731_v30 = vld [vmem:[#allocation4 + $0x10] sm:$0xff]  ;;  %v1732_v10 = vld [vmem:[#allocation4 + $0x18] sm:$0xff]  ;;  %v4474_v44 = vpop.eup %4473  ;;  %p4537_p0 = pnand %p4536_p13, %p4530_p10 }
 0x485   :  { %4143 = vmatpush3.msra.mxu0 %v1731_v30  ;;  %4148 = vmatpush3.msra.mxu1 %v1732_v10  ;;  %v2441_v36 = vmul.f32 %v4474_v44, %v5090_v47 }
 0x486   :  { %4145 = vmatmul.mubr.msk.f32.vlgmr.msra.gmra.mxu0 %vm2353_vm4, %v2436_v33  ;;  %4150 = vmatmul.mubr.msk.f32.vlgmr.msra.gmra.mxu1 %vm2353_vm4, %v2437_v34 }
 0x487   :  { %4152 = vmatprep.subr.mxu0 %v4568_v26  ;;  %4157 = vmatprep.subr.mxu1 %v4568_v26 }
 0x488   :  { %4153 = vmatpush3.msra.mxu0 %v1733_v38  ;;  %4158 = vmatpush3.msra.mxu1 %v1734_v55 }
 0x489   :  { %4154 = vmatprep.mubr.msk.f32.mxu0 %vm4569_vm2, %v4568_v26  ;;  %4159 = vmatprep.mubr.msk.f32.mxu1 %vm4569_vm2, %v4568_v26  ;;  %v2422_v40 = vpop.xlane.xlu1 %2421 }
 0x48a   :  { %4155 = vmatmul.mubr.msk.f32.vlgmr.msra.gmra.mxu0 %vm2353_vm4, %v2438_v14  ;;  %4160 = vmatmul.mubr.msk.f32.vlgmr.msra.gmra.mxu1 %vm2353_vm4, %v2439_v21  ;;  %4475 = vrcp.f32 %v2422_v40 }
 0x48b   :  { %4162 = vmatprep.subr.mxu0 %v4568_v26  ;;  %4167 = vmatprep.subr.mxu1 %v4568_v26 }
 0x48c   :  { %4169 = vmatprep.mubr.msk.f32.mxu1 %vm4569_vm2, %v4568_v26  ;;  %4164 = vmatprep.mubr.msk.f32.mxu0 %vm4569_vm2, %v4568_v26  ;;  %v4433_v26 = vunpack.i.l.bf16 %v4432_v5 }
 0x48d   :  { %v1633_v25 = vpop.permute.xlu1 %1632 }
 0x48e   :  { %v1702_v29 = vadd.f32 %v5041_v53, %v1633_v25  ;;  %v1707_v41 = vadd.f32 %v5039_v31, %v1633_v25  ;;  %v4442_v31 = vpop.permute.xlu0 %4441 }
 0x48f   :  { %v4443_v48 = vunpack.i.l.bf16 %v4442_v31  ;;  %v4444_v57 = vunpack.i.h.bf16 %v4442_v31 }
 0x490   :  { %1711 = vst.msk [vmem:[#allocation4 + $0x30] sm:$0xff] %vm261_vm3, %v1702_v29  ;;  %1712 = vst.msk [vmem:[#allocation4 + $0x38] sm:$0xff] %vm261_vm3, %v1707_v41 }
 0x491   :  { %v4437_v42 = vpop.permute.xlu1 %4436 }
 0x492   :  { %v4438_v39 = vunpack.i.l.bf16 %v4437_v42  ;;  %v4439_v8 = vunpack.i.h.bf16 %v4437_v42  ;;  %v3314_v60 = vpop.permute.xlu0 %3313 }
 0x495   :  { %v3316_v47 = vpop.permute.xlu1 %3315 }
 0x497   :  { %v4476_v23 = vpop.eup %4475  ;;  %v1735_v43 = vld [vmem:[#allocation4 + $0x30] sm:$0xff]  ;;  %v1736_v52 = vld [vmem:[#allocation4 + $0x38] sm:$0xff] }
 0x498   :  { %4163 = vmatpush3.msra.mxu0 %v1735_v43  ;;  %4168 = vmatpush3.msra.mxu1 %v1736_v52  ;;  %v2440_v53 = vmul.f32 %v4476_v23, %v5096_v49 }
 0x499   :  { %4170 = vmatmul.mubr.msk.f32.vlgmr.msra.gmra.mxu1 %vm2353_vm4, %v2441_v36  ;;  %4179 = vmatprep.subr.mxu1 %v4438_v39 }
 0x49a   :  { %4165 = vmatmul.mubr.msk.f32.vlgmr.msra.gmra.mxu0 %vm2353_vm4, %v2440_v53  ;;  %4180 = vmatpush3.msra.mxu1 %v4438_v39 }
 0x49b   :  { %4181 = vmatprep.subr.mxu1 %v4439_v8  ;;  %4172 = vmatprep.subr.mxu0 %v4433_v26 }
 0x49c   :  { %4182 = vmatpush3.msra.mxu1 %v4439_v8  ;;  %4173 = vmatpush3.msra.mxu0 %v4433_v26 }
 0x49d   :  { %4174 = vmatprep.subr.mxu0 %v4434_v18  ;;  %4193 = vmatprep.subr.mxu1 %v3316_v47 }
 0x49e   :  { %4175 = vmatpush3.msra.mxu0 %v4434_v18 }
 0x49f   :  { %4186 = vmatprep.subr.mxu0 %v4443_v48 }
 0x4ef   :  { %v3428_v14 = vpop.permute.xlu1 %3427  ;;  %v3514_v41 = vpop.permute.xlu0 %3513 }
 0x4f0   :  { %v2511_v32 = vpop.f32.mrf.mxu0 }
 0x4f1   :  { %4183 = vmatprep.mubr.msk.f32.mxu1 %vm261_vm3, %v2511_v32 }
 0x4f2   :  { %v4136_v49 = vpop.f32.mrf.mxu0 }
 0x4f4   :  { %v2584_v16 = vpop.f32.mrf.mxu1 }
 0x4f5   :  { %4184 = vmatmul.mubr.msk.f32.vlgmr.msra.gmra.mxu1 %vm261_vm3, %v2584_v16 }
 0x4f6   :  { %v4141_v0 = vpop.f32.mrf.mxu1  ;;  %4194 = vmatpush3.msra.mxu1 %v3316_v47 }
 0x4f7   :  { %4195 = vmatprep.subr.mxu1 %v3314_v60 }
 0x4f8   :  { %4196 = vmatpush3.msra.mxu1 %v3314_v60 }
 0x546   :  { %v2657_v45 = vpop.f32.mrf.mxu0  ;;  %v2730_v54 = vpop.f32.mrf.mxu1 }
 0x547   :  { %4176 = vmatprep.mubr.msk.f32.mxu0 %vm261_vm3, %v2657_v45 }
 0x548   :  { %v4146_v62 = vpop.f32.mrf.mxu0  ;;  %v4151_v46 = vpop.f32.mrf.mxu1  ;;  %4177 = vmatmul.mubr.msk.f32.vlgmr.msra.gmra.mxu0 %vm261_vm3, %v2730_v54 }
 0x549   :  { %4187 = vmatpush3.msra.mxu0 %v4443_v48 }
 0x54a   :  { %v2803_v3 = vpop.f32.mrf.mxu0  ;;  %v2876_v4 = vpop.f32.mrf.mxu1  ;;  %4188 = vmatprep.subr.mxu0 %v4444_v57 }
 0x54b   :  { %4189 = vmatpush3.msra.mxu0 %v4444_v57  ;;  %4190 = vmatprep.mubr.msk.f32.mxu0 %vm261_vm3, %v2803_v3 }
 0x54c   :  { %v4156_v11 = vpop.f32.mrf.mxu0  ;;  %v4161_v51 = vpop.f32.mrf.mxu1  ;;  %4191 = vmatmul.mubr.msk.f32.vlgmr.msra.gmra.mxu0 %vm261_vm3, %v2876_v4  ;;  %4200 = vmatprep.subr.mxu0 %v3426_v1 }
 0x54d   :  { %4201 = vmatpush3.msra.mxu0 %v3426_v1 }
 0x54e   :  { %4202 = vmatprep.subr.mxu0 %v3425_v17 }
 0x54f   :  { %4203 = vmatpush3.msra.mxu0 %v3425_v17 }
 0x550   :  { %4204 = vmatprep.subr.mxu0 %v3424_v9 }
 0x551   :  { %4205 = vmatpush3.msra.mxu0 %v3424_v9 }
 0x552   :  { %4206 = vmatprep.subr.mxu0 %v3423_v63 }
 0x553   :  { %4207 = vmatpush3.msra.mxu0 %v3423_v63 }
 0x554   :  { %4208 = vmatprep.subr.mxu0 %v3422_v61 }
 0x555   :  { %4209 = vmatpush3.msra.mxu0 %v3422_v61 }
 0x556   :  { %4210 = vmatprep.subr.mxu0 %v3421_v35 }
 0x557   :  { %4211 = vmatpush3.msra.mxu0 %v3421_v35 }
 0x558   :  { %4212 = vmatprep.subr.mxu0 %v3420_v27 }
 0x559   :  { %v3022_v56 = vpop.f32.mrf.mxu1  ;;  %4213 = vmatpush3.msra.mxu0 %v3420_v27 }
 0x55a   :  { %v2949_v12 = vpop.f32.mrf.mxu0  ;;  %4214 = vmatprep.subr.mxu0 %v3419_v2 }
 0x55b   :  { %v4171_v13 = vpop.f32.mrf.mxu1  ;;  %4197 = vmatprep.mubr.msk.f32.mxu1 %vm261_vm3, %v2949_v12  ;;  %4215 = vmatpush3.msra.mxu0 %v3419_v2 }
 0x55c   :  { %v4166_v15 = vpop.f32.mrf.mxu0  ;;  %4198 = vmatmul.mubr.msk.f32.vlgmr.msra.gmra.mxu1 %vm261_vm3, %v3022_v56 }
 0x5b5   :  { %v4185_v6 = vpop.f32.mrf.mxu1 }
 0x5b7   :  { %v3203_v28 = vpop.f32.mrf.mxu1 }
 0x608   :  { %v4178_v24 = vpop.f32.mrf.mxu0 }
 0x609   :  { %v3209_v19 = vadd.f32 %v4185_v6, %v4178_v24 }
 0x60a   :  { %v3114_v22 = vpop.f32.mrf.mxu0 }
 0x60b   :  { %v3204_v10 = vadd.f32 %v3203_v28, %v3114_v22 }
 0x60c   :  { %v4192_v7 = vpop.f32.mrf.mxu0 }
 0x60d   :  { %v3306_v59 = vadd.f32 %v4192_v7, %v3209_v19 }
 0x60e   :  { %v3296_v30 = vpop.f32.mrf.mxu0 }
 0x60f   :  { %v3305_v50 = vadd.f32 %v3296_v30, %v3204_v10 }
 0x61c   :  { %v4199_v33 = vpop.f32.mrf.mxu1 }
 0x61d   :  { %v3401_v34 = vadd.f32 %v4199_v33, %v3306_v59 }
 0x61e   :  { %v3391_v37 = vpop.f32.mrf.mxu1 }
 0x61f   :  { %v3400_v38 = vadd.f32 %v3391_v37, %v3305_v50  ;;  %v3410_v55 = vadd.f32 %v3666_v20, %v3401_v34 }
 0x621   :  { %v5198_v58 = vadd.f32 %v3666_v20, %v3400_v38 }
 0x623   :  { %4216 = vmatprep.mubr.msk.f32.mxu0 %vm179_vm1, %v5198_v58 }
 0x624   :  { %4217 = vmatmul.mubr.msk.f32.vlgmr.msra.gmra.mxu0 %vm179_vm1, %v3410_v55 }
 0x6e4   :  { %v4218_v21 = vpop.f32.mrf.mxu0 }
 0x6e5   :  { %v3508_v40 = vadd.f32 %v4218_v21, %v3428_v14 }
 0x6e6   :  { %v3502_v25 = vpop.f32.mrf.mxu0 }
 0x6e7   :  { %4477 = vtanh.f32 %v3508_v40  ;;  %v3503_v29 = vadd.f32 %v3502_v25, %v3428_v14 }
 0x6e9   :  { %4479 = vtanh.f32 %v3503_v29 }
 0x6f4   :  { %v4478_v42 = vpop.eup %4477 }
 0x6f5   :  { %v3517_v5 = vmul.f32 %v4478_v42, %v3514_v41 }
 0x6f6   :  { %v4480_v44 = vpop.eup %4479 }
 0x6f7   :  { %v3516_v39 = vmul.f32 %v4480_v44, %v3514_v41  ;;  %v3521_v23 = vsel %vm76_vm0, %v3517_v5, 0.0 }
 0x6f8   :  { %3522 = vadd.xlane.f32.xlu1 %v3521_v23 }
 0x6f9   :  { %v3518_v43 = vsel %vm76_vm0, %v3516_v39, 0.0 }
 0x6fa   :  { %3519 = vadd.xlane.f32.xlu0 %v3518_v43 }
 0x781   :  { %v3523_v52 = vpop.xlane.xlu1 %3522 }
 0x782   :  { %v3530_v36 = vrot.slane %v3523_v52, 4 }
 0x783   :  { %v3520_v51 = vpop.xlane.xlu0 %3519 }
 0x784   :  { %v3531_v8 = vmax.f32 %v3523_v52, %v3530_v36  ;;  %v3524_v12 = vrot.slane %v3520_v51, 4 }
 0x786   :  { %v3532_v26 = vrot.slane %v3531_v8, 2  ;;  %v3525_v1 = vmax.f32 %v3520_v51, %v3524_v12 }
 0x788   :  { %v3533_v53 = vmax.f32 %v3531_v8, %v3532_v26  ;;  %v3526_v9 = vrot.slane %v3525_v1, 2 }
 0x78a   :  { %v3534_v31 = vrot.slane %v3533_v53, 1  ;;  %v3527_v63 = vmax.f32 %v3525_v1, %v3526_v9 }
 0x78c   :  { %v3535_v18 = vmax.f32 %v3533_v53, %v3534_v31  ;;  %v3528_v20 = vrot.slane %v3527_v63, 1 }
 0x78e   :  { %v3537_v48 = vsub.f32 %v3523_v52, %v3535_v18  ;;  %v3529_v61 = vmax.f32 %v3527_v63, %v3528_v20 }
 0x790   :  { %v3540_v47 = vmul.f32 1.442695, %v3537_v48  ;;  %v3536_v35 = vsub.f32 %v3520_v51, %v3529_v61 }
 0x792   :  { %4481 = vpow2.f32 %v3540_v47  ;;  %v3538_v27 = vmul.f32 1.442695, %v3536_v35 }
 0x79f   :  { %v4482_v32 = vpop.eup %4481 }
 0x7a0   :  { %v3548_v49 = vrot.slane %v4482_v32, 4 }
 0x7a2   :  { %v3549_v16 = vadd.f32 %v4482_v32, %v3548_v49 }
 0x7a4   :  { %v3550_v60 = vrot.slane %v3549_v16, 2 }
 0x7a6   :  { %v3551_v0 = vadd.f32 %v3550_v60, %v3549_v16 }
 0x7a8   :  { %v3552_v57 = vrot.slane %v3551_v0, 1 }
 0x7aa   :  { %v3553_v45 = vadd.f32 %v3552_v57, %v3551_v0 }
 0x7ac   :  { %4483 = vrcp.f32 %v3553_v45 }
 0x7ad   :  { %4485 = vpow2.f32 %v3538_v27 }
 0x7b9   :  { %v4484_v54 = vpop.eup %4483 }
 0x7ba   :  { %v3557_v62 = vmul.f32 %v4484_v54, %v4482_v32  ;;  %v4486_v2 = vpop.eup %4485 }
 0x7bb   :  { %v3542_v24 = vrot.slane %v4486_v2, 4 }
 0x7bc   :  { %v3559_v46 = vmul.f32 %v3557_v62, %v3410_v55 }
 0x7bd   :  { %v3543_v22 = vadd.f32 %v4486_v2, %v3542_v24 }
 0x7be   :  { %v3567_v3 = vsel %vm179_vm1, %v3559_v46, 0.0 }
 0x7bf   :  { %v3568_v4 = vrot.slane %v3567_v3, 4  ;;  %v3544_v6 = vrot.slane %v3543_v22, 2 }
 0x7c1   :  { %v3569_v11 = vadd.f32 %v3568_v4, %v3567_v3  ;;  %v3545_v7 = vadd.f32 %v3544_v6, %v3543_v22 }
 0x7c3   :  { %v3570_v56 = vrot.slane %v3569_v11, 2  ;;  %v3546_v28 = vrot.slane %v3545_v7, 1 }
 0x7c5   :  { %v3571_v13 = vadd.f32 %v3570_v56, %v3569_v11  ;;  %v3547_v19 = vadd.f32 %v3546_v28, %v3545_v7 }
 0x7c7   :  { %v3572_v15 = vrot.slane %v3571_v13, 1  ;;  %4487 = vrcp.f32 %v3547_v19 }
 0x7c9   :  { %v3573_v17 = vadd.f32 %v3572_v15, %v3571_v13 }
 0x7cb   :  { %3575 = vrot.lane.b32.xlu0 %v3573_v17, %s4562_s1 }
 0x7d4   :  { %v4488_v30 = vpop.eup %4487 }
 0x7d5   :  { %v3555_v10 = vmul.f32 %v4488_v30, %v4486_v2 }
 0x7d7   :  { %v3558_v59 = vmul.f32 %v3555_v10, %v5198_v58 }
 0x7d9   :  { %v3560_v33 = vsel %vm179_vm1, %v3558_v59, 0.0 }
 0x7da   :  { %v3561_v50 = vrot.slane %v3560_v33, 4 }
 0x7dc   :  { %v3562_v34 = vadd.f32 %v3561_v50, %v3560_v33 }
 0x7de   :  { %v3563_v37 = vrot.slane %v3562_v34, 2 }
 0x7e0   :  { %v3564_v38 = vadd.f32 %v3563_v37, %v3562_v34 }
 0x7e2   :  { %v3565_v55 = vrot.slane %v3564_v38, 1 }
 0x7e4   :  { %v3566_v14 = vadd.f32 %v3565_v55, %v3564_v38 }
 0x83d   :  { %v3576_v21 = vpop.permute.xlu0 %3575 }
 0x83e   :  { %v3578_v40 = vsel %vm179_vm1, %v3566_v14, %v3576_v21 }
 0x83f   :  { %3579 = vst [vmem:[#allocation10] sm:$0x1] %v3578_v40 }
 0x840   :  { %4540 = shalt.err (!%p4537_p0)
}
 0x841   :  { %3589 = dma.vmem_to_hbm [thread:$0]  %s3587_s12, 16, %s5216_s3, [#allocation7]  }
 0x842   :  { %4553 = dma.done.wait [#allocation7], 16  }
 0x843   :  { %4554 = vsyncadd [#allocation7], 4294967280 }
 0x844   :  { %3593 = vsyncpa [#allocation6], 1 }
 0x845   :  { %3594 = vsyncpa [#allocation9], 1 }
 0x846   :  { %3595 = vsyncpa [#allocation7], 1 }

</bundles_post_ra>
